<compile_context>
chip_gen: v7x
topology: tpu7x:2x2x1
jax: 0.10.0
libtpu: 0.0.40
codegen_flags: <defaults>
</compile_context>

<pallas_src>
import jax
import jax.numpy as jnp
from jax.experimental import pallas as pl
from jax.experimental.pallas import tpu as pltpu

BETA = 0.9
THRESHOLD = 1.0
NUM_STEPS = 100

NUM_INPUTS = 2
NUM_HIDDEN = 64
NUM_OUTPUTS = 1


def snn_net_kernel(x_ref, w1_ref, b1_ref, w2_ref, b2_ref, out_ref):
    # x_ref:  (B, I)   w1_ref: (I, H)   b1_ref: (1, H)
    # w2_ref: (O, H)   b2_ref: (1, O)   out_ref: (B, O)
    x = x_ref[...]
    w1 = w1_ref[...]

    # fc1 on the VPU: K = NUM_INPUTS broadcast multiply-adds (no MXU).
    cur1 = b1_ref[...]                                # (1, H) -> broadcasts
    for k in range(NUM_INPUTS):
        cur1 = cur1 + x[:, k:k + 1] * w1[k:k + 1, :]  # (B, H)

    # Hoist the loop invariant so the per-step update is cmp -> select -> add.
    cur1_sub = cur1 - THRESHOLD

    # Fully unrolled leaky-integrate-and-fire time loop (reset by subtraction,
    # reset based on the previous step's membrane potential).
    mem = jnp.zeros_like(cur1)
    for _ in range(NUM_STEPS):
        mem = BETA * mem + jnp.where(mem > THRESHOLD, cur1_sub, cur1)

    # Spike of the final step feeds fc2; fc2 (H -> 1) as select + lane-reduce.
    w2 = w2_ref[...]                                            # (1, H)
    contrib = jnp.where(mem > THRESHOLD,
                        jnp.broadcast_to(w2, mem.shape),
                        jnp.zeros_like(mem))                    # (B, H)
    cur2 = jnp.sum(contrib, axis=1, keepdims=True) + b2_ref[...]  # (B, O)
    out_ref[...] = cur2.astype(out_ref.dtype)


def snn_net_forward(x, w1, b1, w2, b2):
    """x: (B, num_inputs). Torch layouts: w1 (H, I), b1 (H,), w2 (O, H), b2 (O,)."""
    B = x.shape[0]
    w1t = jnp.transpose(w1)                    # (I, H)
    b1_2d = b1.reshape(1, -1)                  # (1, H)
    w2_row = w2.reshape(NUM_OUTPUTS, -1)       # (O, H) == (1, H)
    b2_2d = b2.reshape(1, -1)                  # (1, O)

    vmem_spec = pl.BlockSpec(memory_space=pltpu.MemorySpace.VMEM)
    # Whole problem fits in a few KiB of VMEM: no grid, no tiling needed.
    # TODO(synk): if batch is ever scaled to hundreds of rows, add a batch grid
    # axis with dimension_semantics=("parallel",) so v7x's two TensorCores split it.
    return pl.pallas_call(
        snn_net_kernel,
        out_shape=jax.ShapeDtypeStruct((B, NUM_OUTPUTS), jnp.float32),
        in_specs=[vmem_spec] * 5,
        out_specs=vmem_spec,
    )(x, w1t, b1_2d, w2_row, b2_2d)


def _ref_forward(x, w1, b1, w2, b2):
    """Pure-JAX reference matching the PyTorch/snntorch semantics.

    Written with the same arithmetic ordering as the kernel; the step update
    `BETA*mem + where(mem > THR, cur1 - THR, cur1)` is algebraically identical
    to snntorch's reset-by-subtraction `BETA*mem + cur1 - (mem > THR)*THR`.
    """
    cur1 = b1.reshape(1, -1)
    w1t = w1.T
    for k in range(NUM_INPUTS):
        cur1 = cur1 + x[:, k:k + 1] * w1t[k:k + 1, :]
    cur1_sub = cur1 - THRESHOLD
    mem = jnp.zeros_like(cur1)
    for _ in range(NUM_STEPS):
        mem = BETA * mem + jnp.where(mem > THRESHOLD, cur1_sub, cur1)
    spk = (mem > THRESHOLD).astype(jnp.float32)
    return spk @ w2.T + b2


if __name__ == "__main__":
    key = jax.random.PRNGKey(0)
    k_x, k_w1, k_b1, k_w2, k_b2 = jax.random.split(key, 5)

    batch = 8
    x = jax.random.normal(k_x, (batch, NUM_INPUTS), dtype=jnp.float32)

    # Deterministic parameter init (uniform, torch-Linear-like fan-in bound).
    bound1 = 1.0 / (NUM_INPUTS ** 0.5)
    w1 = jax.random.uniform(k_w1, (NUM_HIDDEN, NUM_INPUTS), jnp.float32, -bound1, bound1)
    b1 = jax.random.uniform(k_b1, (NUM_HIDDEN,), jnp.float32, -bound1, bound1)
    bound2 = 1.0 / (NUM_HIDDEN ** 0.5)
    w2 = jax.random.uniform(k_w2, (NUM_OUTPUTS, NUM_HIDDEN), jnp.float32, -bound2, bound2)
    b2 = jax.random.uniform(k_b2, (NUM_OUTPUTS,), jnp.float32, -bound2, bound2)

    out = jax.block_until_ready(snn_net_forward(x, w1, b1, w2, b2))
    ref = _ref_forward(x, w1, b1, w2, b2)

    assert out.shape == (batch, NUM_OUTPUTS), out.shape
    assert jnp.allclose(out, ref, atol=1e-5, rtol=1e-5), (out, ref)

    print("KERNEL_OK")
</pallas_src>

<mosaic_0001>
module attributes {stable_mosaic.version = 11 : i64} {
  func.func @snn_net_kernel(%arg0: memref<8x2xf32, #tpu.memory_space<vmem>>, %arg1: memref<2x64xf32, #tpu.memory_space<vmem>>, %arg2: memref<1x64xf32, #tpu.memory_space<vmem>>, %arg3: memref<1x64xf32, #tpu.memory_space<vmem>>, %arg4: memref<1x1xf32, #tpu.memory_space<vmem>>, %arg5: memref<8x1xf32, #tpu.memory_space<vmem>>) attributes {dimension_semantics = [], scalar_prefetch = 0 : i64, scratch_operands = 0 : i64, tpu.core_type = #tpu.core_type<tc>} {
    %c0 = arith.constant 0 : index
    %c0_0 = arith.constant 0 : index
    %0 = vector.load %arg0[%c0, %c0_0] : memref<8x2xf32, #tpu.memory_space<vmem>>, vector<8x2xf32>
    %c0_1 = arith.constant 0 : index
    %c0_2 = arith.constant 0 : index
    %1 = vector.load %arg1[%c0_1, %c0_2] : memref<2x64xf32, #tpu.memory_space<vmem>>, vector<2x64xf32>
    %c0_3 = arith.constant 0 : index
    %c0_4 = arith.constant 0 : index
    %2 = vector.load %arg2[%c0_3, %c0_4] : memref<1x64xf32, #tpu.memory_space<vmem>>, vector<1x64xf32>
    %3 = vector.extract_strided_slice %0 {offsets = [0, 0], sizes = [8, 1], strides = [1, 1]} : vector<8x2xf32> to vector<8x1xf32>
    %4 = vector.extract_strided_slice %1 {offsets = [0, 0], sizes = [1, 64], strides = [1, 1]} : vector<2x64xf32> to vector<1x64xf32>
    %5 = vector.broadcast %3 : vector<8x1xf32> to vector<8x64xf32>
    %6 = vector.broadcast %4 : vector<1x64xf32> to vector<8x64xf32>
    %7 = arith.mulf %5, %6 : vector<8x64xf32>
    %8 = vector.broadcast %2 : vector<1x64xf32> to vector<8x64xf32>
    %9 = arith.addf %8, %7 : vector<8x64xf32>
    %10 = vector.extract_strided_slice %0 {offsets = [0, 1], sizes = [8, 1], strides = [1, 1]} : vector<8x2xf32> to vector<8x1xf32>
    %11 = vector.extract_strided_slice %1 {offsets = [1, 0], sizes = [1, 64], strides = [1, 1]} : vector<2x64xf32> to vector<1x64xf32>
    %12 = vector.broadcast %10 : vector<8x1xf32> to vector<8x64xf32>
    %13 = vector.broadcast %11 : vector<1x64xf32> to vector<8x64xf32>
    %14 = arith.mulf %12, %13 : vector<8x64xf32>
    %15 = arith.addf %9, %14 : vector<8x64xf32>
    %cst = arith.constant 1.000000e+00 : f32
    %16 = vector.broadcast %cst : f32 to vector<8x64xf32>
    %17 = arith.subf %15, %16 : vector<8x64xf32>
    %cst_5 = arith.constant 0.000000e+00 : f32
    %18 = vector.broadcast %cst_5 : f32 to vector<8x64xf32>
    %cst_6 = arith.constant 0.899999976 : f32
    %19 = vector.broadcast %cst_6 : f32 to vector<8x64xf32>
    %20 = arith.mulf %19, %18 : vector<8x64xf32>
    %cst_7 = arith.constant 1.000000e+00 : f32
    %21 = vector.broadcast %cst_7 : f32 to vector<8x64xf32>
    %22 = arith.cmpf ogt, %18, %21 : vector<8x64xf32>
    %23 = arith.select %22, %17, %15 : vector<8x64xi1>, vector<8x64xf32>
    %24 = arith.addf %20, %23 : vector<8x64xf32>
    %cst_8 = arith.constant 0.899999976 : f32
    %25 = vector.broadcast %cst_8 : f32 to vector<8x64xf32>
    %26 = arith.mulf %25, %24 : vector<8x64xf32>
    %cst_9 = arith.constant 1.000000e+00 : f32
    %27 = vector.broadcast %cst_9 : f32 to vector<8x64xf32>
    %28 = arith.cmpf ogt, %24, %27 : vector<8x64xf32>
    %29 = arith.select %28, %17, %15 : vector<8x64xi1>, vector<8x64xf32>
    %30 = arith.addf %26, %29 : vector<8x64xf32>
    %cst_10 = arith.constant 0.899999976 : f32
    %31 = vector.broadcast %cst_10 : f32 to vector<8x64xf32>
    %32 = arith.mulf %31, %30 : vector<8x64xf32>
    %cst_11 = arith.constant 1.000000e+00 : f32
    %33 = vector.broadcast %cst_11 : f32 to vector<8x64xf32>
    %34 = arith.cmpf ogt, %30, %33 : vector<8x64xf32>
    %35 = arith.select %34, %17, %15 : vector<8x64xi1>, vector<8x64xf32>
    %36 = arith.addf %32, %35 : vector<8x64xf32>
    %cst_12 = arith.constant 0.899999976 : f32
    %37 = vector.broadcast %cst_12 : f32 to vector<8x64xf32>
    %38 = arith.mulf %37, %36 : vector<8x64xf32>
    %cst_13 = arith.constant 1.000000e+00 : f32
    %39 = vector.broadcast %cst_13 : f32 to vector<8x64xf32>
    %40 = arith.cmpf ogt, %36, %39 : vector<8x64xf32>
    %41 = arith.select %40, %17, %15 : vector<8x64xi1>, vector<8x64xf32>
    %42 = arith.addf %38, %41 : vector<8x64xf32>
    %cst_14 = arith.constant 0.899999976 : f32
    %43 = vector.broadcast %cst_14 : f32 to vector<8x64xf32>
    %44 = arith.mulf %43, %42 : vector<8x64xf32>
    %cst_15 = arith.constant 1.000000e+00 : f32
    %45 = vector.broadcast %cst_15 : f32 to vector<8x64xf32>
    %46 = arith.cmpf ogt, %42, %45 : vector<8x64xf32>
    %47 = arith.select %46, %17, %15 : vector<8x64xi1>, vector<8x64xf32>
    %48 = arith.addf %44, %47 : vector<8x64xf32>
    %cst_16 = arith.constant 0.899999976 : f32
    %49 = vector.broadcast %cst_16 : f32 to vector<8x64xf32>
    %50 = arith.mulf %49, %48 : vector<8x64xf32>
    %cst_17 = arith.constant 1.000000e+00 : f32
    %51 = vector.broadcast %cst_17 : f32 to vector<8x64xf32>
    %52 = arith.cmpf ogt, %48, %51 : vector<8x64xf32>
    %53 = arith.select %52, %17, %15 : vector<8x64xi1>, vector<8x64xf32>
    %54 = arith.addf %50, %53 : vector<8x64xf32>
    %cst_18 = arith.constant 0.899999976 : f32
    %55 = vector.broadcast %cst_18 : f32 to vector<8x64xf32>
    %56 = arith.mulf %55, %54 : vector<8x64xf32>
    %cst_19 = arith.constant 1.000000e+00 : f32
    %57 = vector.broadcast %cst_19 : f32 to vector<8x64xf32>
    %58 = arith.cmpf ogt, %54, %57 : vector<8x64xf32>
    %59 = arith.select %58, %17, %15 : vector<8x64xi1>, vector<8x64xf32>
    %60 = arith.addf %56, %59 : vector<8x64xf32>
    %cst_20 = arith.constant 0.899999976 : f32
    %61 = vector.broadcast %cst_20 : f32 to vector<8x64xf32>
    %62 = arith.mulf %61, %60 : vector<8x64xf32>
    %cst_21 = arith.constant 1.000000e+00 : f32
    %63 = vector.broadcast %cst_21 : f32 to vector<8x64xf32>
    %64 = arith.cmpf ogt, %60, %63 : vector<8x64xf32>
    %65 = arith.select %64, %17, %15 : vector<8x64xi1>, vector<8x64xf32>
    %66 = arith.addf %62, %65 : vector<8x64xf32>
    %cst_22 = arith.constant 0.899999976 : f32
    %67 = vector.broadcast %cst_22 : f32 to vector<8x64xf32>
    %68 = arith.mulf %67, %66 : vector<8x64xf32>
    %cst_23 = arith.constant 1.000000e+00 : f32
    %69 = vector.broadcast %cst_23 : f32 to vector<8x64xf32>
    %70 = arith.cmpf ogt, %66, %69 : vector<8x64xf32>
    %71 = arith.select %70, %17, %15 : vector<8x64xi1>, vector<8x64xf32>
    %72 = arith.addf %68, %71 : vector<8x64xf32>
    %cst_24 = arith.constant 0.899999976 : f32
    %73 = vector.broadcast %cst_24 : f32 to vector<8x64xf32>
    %74 = arith.mulf %73, %72 : vector<8x64xf32>
    %cst_25 = arith.constant 1.000000e+00 : f32
    %75 = vector.broadcast %cst_25 : f32 to vector<8x64xf32>
    %76 = arith.cmpf ogt, %72, %75 : vector<8x64xf32>
    %77 = arith.select %76, %17, %15 : vector<8x64xi1>, vector<8x64xf32>
    %78 = arith.addf %74, %77 : vector<8x64xf32>
    %cst_26 = arith.constant 0.899999976 : f32
    %79 = vector.broadcast %cst_26 : f32 to vector<8x64xf32>
    %80 = arith.mulf %79, %78 : vector<8x64xf32>
    %cst_27 = arith.constant 1.000000e+00 : f32
    %81 = vector.broadcast %cst_27 : f32 to vector<8x64xf32>
    %82 = arith.cmpf ogt, %78, %81 : vector<8x64xf32>
    %83 = arith.select %82, %17, %15 : vector<8x64xi1>, vector<8x64xf32>
    %84 = arith.addf %80, %83 : vector<8x64xf32>
    %cst_28 = arith.constant 0.899999976 : f32
    %85 = vector.broadcast %cst_28 : f32 to vector<8x64xf32>
    %86 = arith.mulf %85, %84 : vector<8x64xf32>
    %cst_29 = arith.constant 1.000000e+00 : f32
    %87 = vector.broadcast %cst_29 : f32 to vector<8x64xf32>
    %88 = arith.cmpf ogt, %84, %87 : vector<8x64xf32>
    %89 = arith.select %88, %17, %15 : vector<8x64xi1>, vector<8x64xf32>
    %90 = arith.addf %86, %89 : vector<8x64xf32>
    %cst_30 = arith.constant 0.899999976 : f32
    %91 = vector.broadcast %cst_30 : f32 to vector<8x64xf32>
    %92 = arith.mulf %91, %90 : vector<8x64xf32>
    %cst_31 = arith.constant 1.000000e+00 : f32
    %93 = vector.broadcast %cst_31 : f32 to vector<8x64xf32>
    %94 = arith.cmpf ogt, %90, %93 : vector<8x64xf32>
    %95 = arith.select %94, %17, %15 : vector<8x64xi1>, vector<8x64xf32>
    %96 = arith.addf %92, %95 : vector<8x64xf32>
    %cst_32 = arith.constant 0.899999976 : f32
    %97 = vector.broadcast %cst_32 : f32 to vector<8x64xf32>
    %98 = arith.mulf %97, %96 : vector<8x64xf32>
    %cst_33 = arith.constant 1.000000e+00 : f32
    %99 = vector.broadcast %cst_33 : f32 to vector<8x64xf32>
    %100 = arith.cmpf ogt, %96, %99 : vector<8x64xf32>
    %101 = arith.select %100, %17, %15 : vector<8x64xi1>, vector<8x64xf32>
    %102 = arith.addf %98, %101 : vector<8x64xf32>
    %cst_34 = arith.constant 0.899999976 : f32
    %103 = vector.broadcast %cst_34 : f32 to vector<8x64xf32>
    %104 = arith.mulf %103, %102 : vector<8x64xf32>
    %cst_35 = arith.constant 1.000000e+00 : f32
    %105 = vector.broadcast %cst_35 : f32 to vector<8x64xf32>
    %106 = arith.cmpf ogt, %102, %105 : vector<8x64xf32>
    %107 = arith.select %106, %17, %15 : vector<8x64xi1>, vector<8x64xf32>
    %108 = arith.addf %104, %107 : vector<8x64xf32>
    %cst_36 = arith.constant 0.899999976 : f32
    %109 = vector.broadcast %cst_36 : f32 to vector<8x64xf32>
    %110 = arith.mulf %109, %108 : vector<8x64xf32>
    %cst_37 = arith.constant 1.000000e+00 : f32
    %111 = vector.broadcast %cst_37 : f32 to vector<8x64xf32>
    %112 = arith.cmpf ogt, %108, %111 : vector<8x64xf32>
    %113 = arith.select %112, %17, %15 : vector<8x64xi1>, vector<8x64xf32>
    %114 = arith.addf %110, %113 : vector<8x64xf32>
    %cst_38 = arith.constant 0.899999976 : f32
    %115 = vector.broadcast %cst_38 : f32 to vector<8x64xf32>
    %116 = arith.mulf %115, %114 : vector<8x64xf32>
    %cst_39 = arith.constant 1.000000e+00 : f32
    %117 = vector.broadcast %cst_39 : f32 to vector<8x64xf32>
    %118 = arith.cmpf ogt, %114, %117 : vector<8x64xf32>
    %119 = arith.select %118, %17, %15 : vector<8x64xi1>, vector<8x64xf32>
    %120 = arith.addf %116, %119 : vector<8x64xf32>
    %cst_40 = arith.constant 0.899999976 : f32
    %121 = vector.broadcast %cst_40 : f32 to vector<8x64xf32>
    %122 = arith.mulf %121, %120 : vector<8x64xf32>
    %cst_41 = arith.constant 1.000000e+00 : f32
    %123 = vector.broadcast %cst_41 : f32 to vector<8x64xf32>
    %124 = arith.cmpf ogt, %120, %123 : vector<8x64xf32>
    %125 = arith.select %124, %17, %15 : vector<8x64xi1>, vector<8x64xf32>
    %126 = arith.addf %122, %125 : vector<8x64xf32>
    %cst_42 = arith.constant 0.899999976 : f32
    %127 = vector.broadcast %cst_42 : f32 to vector<8x64xf32>
    %128 = arith.mulf %127, %126 : vector<8x64xf32>
    %cst_43 = arith.constant 1.000000e+00 : f32
    %129 = vector.broadcast %cst_43 : f32 to vector<8x64xf32>
    %130 = arith.cmpf ogt, %126, %129 : vector<8x64xf32>
    %131 = arith.select %130, %17, %15 : vector<8x64xi1>, vector<8x64xf32>
    %132 = arith.addf %128, %131 : vector<8x64xf32>
    %cst_44 = arith.constant 0.899999976 : f32
    %133 = vector.broadcast %cst_44 : f32 to vector<8x64xf32>
    %134 = arith.mulf %133, %132 : vector<8x64xf32>
    %cst_45 = arith.constant 1.000000e+00 : f32
    %135 = vector.broadcast %cst_45 : f32 to vector<8x64xf32>
    %136 = arith.cmpf ogt, %132, %135 : vector<8x64xf32>
    %137 = arith.select %136, %17, %15 : vector<8x64xi1>, vector<8x64xf32>
    %138 = arith.addf %134, %137 : vector<8x64xf32>
    %cst_46 = arith.constant 0.899999976 : f32
    %139 = vector.broadcast %cst_46 : f32 to vector<8x64xf32>
    %140 = arith.mulf %139, %138 : vector<8x64xf32>
    %cst_47 = arith.constant 1.000000e+00 : f32
    %141 = vector.broadcast %cst_47 : f32 to vector<8x64xf32>
    %142 = arith.cmpf ogt, %138, %141 : vector<8x64xf32>
    %143 = arith.select %142, %17, %15 : vector<8x64xi1>, vector<8x64xf32>
    %144 = arith.addf %140, %143 : vector<8x64xf32>
    %cst_48 = arith.constant 0.899999976 : f32
    %145 = vector.broadcast %cst_48 : f32 to vector<8x64xf32>
    %146 = arith.mulf %145, %144 : vector<8x64xf32>
    %cst_49 = arith.constant 1.000000e+00 : f32
    %147 = vector.broadcast %cst_49 : f32 to vector<8x64xf32>
    %148 = arith.cmpf ogt, %144, %147 : vector<8x64xf32>
    %149 = arith.select %148, %17, %15 : vector<8x64xi1>, vector<8x64xf32>
    %150 = arith.addf %146, %149 : vector<8x64xf32>
    %cst_50 = arith.constant 0.899999976 : f32
    %151 = vector.broadcast %cst_50 : f32 to vector<8x64xf32>
    %152 = arith.mulf %151, %150 : vector<8x64xf32>
    %cst_51 = arith.constant 1.000000e+00 : f32
    %153 = vector.broadcast %cst_51 : f32 to vector<8x64xf32>
    %154 = arith.cmpf ogt, %150, %153 : vector<8x64xf32>
    %155 = arith.select %154, %17, %15 : vector<8x64xi1>, vector<8x64xf32>
    %156 = arith.addf %152, %155 : vector<8x64xf32>
    %cst_52 = arith.constant 0.899999976 : f32
    %157 = vector.broadcast %cst_52 : f32 to vector<8x64xf32>
    %158 = arith.mulf %157, %156 : vector<8x64xf32>
    %cst_53 = arith.constant 1.000000e+00 : f32
    %159 = vector.broadcast %cst_53 : f32 to vector<8x64xf32>
    %160 = arith.cmpf ogt, %156, %159 : vector<8x64xf32>
    %161 = arith.select %160, %17, %15 : vector<8x64xi1>, vector<8x64xf32>
    %162 = arith.addf %158, %161 : vector<8x64xf32>
    %cst_54 = arith.constant 0.899999976 : f32
    %163 = vector.broadcast %cst_54 : f32 to vector<8x64xf32>
    %164 = arith.mulf %163, %162 : vector<8x64xf32>
    %cst_55 = arith.constant 1.000000e+00 : f32
    %165 = vector.broadcast %cst_55 : f32 to vector<8x64xf32>
    %166 = arith.cmpf ogt, %162, %165 : vector<8x64xf32>
    %167 = arith.select %166, %17, %15 : vector<8x64xi1>, vector<8x64xf32>
    %168 = arith.addf %164, %167 : vector<8x64xf32>
    %cst_56 = arith.constant 0.899999976 : f32
    %169 = vector.broadcast %cst_56 : f32 to vector<8x64xf32>
    %170 = arith.mulf %169, %168 : vector<8x64xf32>
    %cst_57 = arith.constant 1.000000e+00 : f32
    %171 = vector.broadcast %cst_57 : f32 to vector<8x64xf32>
    %172 = arith.cmpf ogt, %168, %171 : vector<8x64xf32>
    %173 = arith.select %172, %17, %15 : vector<8x64xi1>, vector<8x64xf32>
    %174 = arith.addf %170, %173 : vector<8x64xf32>
    %cst_58 = arith.constant 0.899999976 : f32
    %175 = vector.broadcast %cst_58 : f32 to vector<8x64xf32>
    %176 = arith.mulf %175, %174 : vector<8x64xf32>
    %cst_59 = arith.constant 1.000000e+00 : f32
    %177 = vector.broadcast %cst_59 : f32 to vector<8x64xf32>
    %178 = arith.cmpf ogt, %174, %177 : vector<8x64xf32>
    %179 = arith.select %178, %17, %15 : vector<8x64xi1>, vector<8x64xf32>
    %180 = arith.addf %176, %179 : vector<8x64xf32>
    %cst_60 = arith.constant 0.899999976 : f32
    %181 = vector.broadcast %cst_60 : f32 to vector<8x64xf32>
    %182 = arith.mulf %181, %180 : vector<8x64xf32>
    %cst_61 = arith.constant 1.000000e+00 : f32
    %183 = vector.broadcast %cst_61 : f32 to vector<8x64xf32>
    %184 = arith.cmpf ogt, %180, %183 : vector<8x64xf32>
    %185 = arith.select %184, %17, %15 : vector<8x64xi1>, vector<8x64xf32>
    %186 = arith.addf %182, %185 : vector<8x64xf32>
    %cst_62 = arith.constant 0.899999976 : f32
    %187 = vector.broadcast %cst_62 : f32 to vector<8x64xf32>
    %188 = arith.mulf %187, %186 : vector<8x64xf32>
    %cst_63 = arith.constant 1.000000e+00 : f32
    %189 = vector.broadcast %cst_63 : f32 to vector<8x64xf32>
    %190 = arith.cmpf ogt, %186, %189 : vector<8x64xf32>
    %191 = arith.select %190, %17, %15 : vector<8x64xi1>, vector<8x64xf32>
    %192 = arith.addf %188, %191 : vector<8x64xf32>
    %cst_64 = arith.constant 0.899999976 : f32
    %193 = vector.broadcast %cst_64 : f32 to vector<8x64xf32>
    %194 = arith.mulf %193, %192 : vector<8x64xf32>
    %cst_65 = arith.constant 1.000000e+00 : f32
    %195 = vector.broadcast %cst_65 : f32 to vector<8x64xf32>
    %196 = arith.cmpf ogt, %192, %195 : vector<8x64xf32>
    %197 = arith.select %196, %17, %15 : vector<8x64xi1>, vector<8x64xf32>
    %198 = arith.addf %194, %197 : vector<8x64xf32>
    %cst_66 = arith.constant 0.899999976 : f32
    %199 = vector.broadcast %cst_66 : f32 to vector<8x64xf32>
    %200 = arith.mulf %199, %198 : vector<8x64xf32>
    %cst_67 = arith.constant 1.000000e+00 : f32
    %201 = vector.broadcast %cst_67 : f32 to vector<8x64xf32>
    %202 = arith.cmpf ogt, %198, %201 : vector<8x64xf32>
    %203 = arith.select %202, %17, %15 : vector<8x64xi1>, vector<8x64xf32>
    %204 = arith.addf %200, %203 : vector<8x64xf32>
    %cst_68 = arith.constant 0.899999976 : f32
    %205 = vector.broadcast %cst_68 : f32 to vector<8x64xf32>
    %206 = arith.mulf %205, %204 : vector<8x64xf32>
    %cst_69 = arith.constant 1.000000e+00 : f32
    %207 = vector.broadcast %cst_69 : f32 to vector<8x64xf32>
    %208 = arith.cmpf ogt, %204, %207 : vector<8x64xf32>
    %209 = arith.select %208, %17, %15 : vector<8x64xi1>, vector<8x64xf32>
    %210 = arith.addf %206, %209 : vector<8x64xf32>
    %cst_70 = arith.constant 0.899999976 : f32
    %211 = vector.broadcast %cst_70 : f32 to vector<8x64xf32>
    %212 = arith.mulf %211, %210 : vector<8x64xf32>
    %cst_71 = arith.constant 1.000000e+00 : f32
    %213 = vector.broadcast %cst_71 : f32 to vector<8x64xf32>
    %214 = arith.cmpf ogt, %210, %213 : vector<8x64xf32>
    %215 = arith.select %214, %17, %15 : vector<8x64xi1>, vector<8x64xf32>
    %216 = arith.addf %212, %215 : vector<8x64xf32>
    %cst_72 = arith.constant 0.899999976 : f32
    %217 = vector.broadcast %cst_72 : f32 to vector<8x64xf32>
    %218 = arith.mulf %217, %216 : vector<8x64xf32>
    %cst_73 = arith.constant 1.000000e+00 : f32
    %219 = vector.broadcast %cst_73 : f32 to vector<8x64xf32>
    %220 = arith.cmpf ogt, %216, %219 : vector<8x64xf32>
    %221 = arith.select %220, %17, %15 : vector<8x64xi1>, vector<8x64xf32>
    %222 = arith.addf %218, %221 : vector<8x64xf32>
    %cst_74 = arith.constant 0.899999976 : f32
    %223 = vector.broadcast %cst_74 : f32 to vector<8x64xf32>
    %224 = arith.mulf %223, %222 : vector<8x64xf32>
    %cst_75 = arith.constant 1.000000e+00 : f32
    %225 = vector.broadcast %cst_75 : f32 to vector<8x64xf32>
    %226 = arith.cmpf ogt, %222, %225 : vector<8x64xf32>
    %227 = arith.select %226, %17, %15 : vector<8x64xi1>, vector<8x64xf32>
    %228 = arith.addf %224, %227 : vector<8x64xf32>
    %cst_76 = arith.constant 0.899999976 : f32
    %229 = vector.broadcast %cst_76 : f32 to vector<8x64xf32>
    %230 = arith.mulf %229, %228 : vector<8x64xf32>
    %cst_77 = arith.constant 1.000000e+00 : f32
    %231 = vector.broadcast %cst_77 : f32 to vector<8x64xf32>
    %232 = arith.cmpf ogt, %228, %231 : vector<8x64xf32>
    %233 = arith.select %232, %17, %15 : vector<8x64xi1>, vector<8x64xf32>
    %234 = arith.addf %230, %233 : vector<8x64xf32>
    %cst_78 = arith.constant 0.899999976 : f32
    %235 = vector.broadcast %cst_78 : f32 to vector<8x64xf32>
    %236 = arith.mulf %235, %234 : vector<8x64xf32>
    %cst_79 = arith.constant 1.000000e+00 : f32
    %237 = vector.broadcast %cst_79 : f32 to vector<8x64xf32>
    %238 = arith.cmpf ogt, %234, %237 : vector<8x64xf32>
    %239 = arith.select %238, %17, %15 : vector<8x64xi1>, vector<8x64xf32>
    %240 = arith.addf %236, %239 : vector<8x64xf32>
    %cst_80 = arith.constant 0.899999976 : f32
    %241 = vector.broadcast %cst_80 : f32 to vector<8x64xf32>
    %242 = arith.mulf %241, %240 : vector<8x64xf32>
    %cst_81 = arith.constant 1.000000e+00 : f32
    %243 = vector.broadcast %cst_81 : f32 to vector<8x64xf32>
    %244 = arith.cmpf ogt, %240, %243 : vector<8x64xf32>
    %245 = arith.select %244, %17, %15 : vector<8x64xi1>, vector<8x64xf32>
    %246 = arith.addf %242, %245 : vector<8x64xf32>
    %cst_82 = arith.constant 0.899999976 : f32
    %247 = vector.broadcast %cst_82 : f32 to vector<8x64xf32>
    %248 = arith.mulf %247, %246 : vector<8x64xf32>
    %cst_83 = arith.constant 1.000000e+00 : f32
    %249 = vector.broadcast %cst_83 : f32 to vector<8x64xf32>
    %250 = arith.cmpf ogt, %246, %249 : vector<8x64xf32>
    %251 = arith.select %250, %17, %15 : vector<8x64xi1>, vector<8x64xf32>
    %252 = arith.addf %248, %251 : vector<8x64xf32>
    %cst_84 = arith.constant 0.899999976 : f32
    %253 = vector.broadcast %cst_84 : f32 to vector<8x64xf32>
    %254 = arith.mulf %253, %252 : vector<8x64xf32>
    %cst_85 = arith.constant 1.000000e+00 : f32
    %255 = vector.broadcast %cst_85 : f32 to vector<8x64xf32>
    %256 = arith.cmpf ogt, %252, %255 : vector<8x64xf32>
    %257 = arith.select %256, %17, %15 : vector<8x64xi1>, vector<8x64xf32>
    %258 = arith.addf %254, %257 : vector<8x64xf32>
    %cst_86 = arith.constant 0.899999976 : f32
    %259 = vector.broadcast %cst_86 : f32 to vector<8x64xf32>
    %260 = arith.mulf %259, %258 : vector<8x64xf32>
    %cst_87 = arith.constant 1.000000e+00 : f32
    %261 = vector.broadcast %cst_87 : f32 to vector<8x64xf32>
    %262 = arith.cmpf ogt, %258, %261 : vector<8x64xf32>
    %263 = arith.select %262, %17, %15 : vector<8x64xi1>, vector<8x64xf32>
    %264 = arith.addf %260, %263 : vector<8x64xf32>
    %cst_88 = arith.constant 0.899999976 : f32
    %265 = vector.broadcast %cst_88 : f32 to vector<8x64xf32>
    %266 = arith.mulf %265, %264 : vector<8x64xf32>
    %cst_89 = arith.constant 1.000000e+00 : f32
    %267 = vector.broadcast %cst_89 : f32 to vector<8x64xf32>
    %268 = arith.cmpf ogt, %264, %267 : vector<8x64xf32>
    %269 = arith.select %268, %17, %15 : vector<8x64xi1>, vector<8x64xf32>
    %270 = arith.addf %266, %269 : vector<8x64xf32>
    %cst_90 = arith.constant 0.899999976 : f32
    %271 = vector.broadcast %cst_90 : f32 to vector<8x64xf32>
    %272 = arith.mulf %271, %270 : vector<8x64xf32>
    %cst_91 = arith.constant 1.000000e+00 : f32
    %273 = vector.broadcast %cst_91 : f32 to vector<8x64xf32>
    %274 = arith.cmpf ogt, %270, %273 : vector<8x64xf32>
    %275 = arith.select %274, %17, %15 : vector<8x64xi1>, vector<8x64xf32>
    %276 = arith.addf %272, %275 : vector<8x64xf32>
    %cst_92 = arith.constant 0.899999976 : f32
    %277 = vector.broadcast %cst_92 : f32 to vector<8x64xf32>
    %278 = arith.mulf %277, %276 : vector<8x64xf32>
    %cst_93 = arith.constant 1.000000e+00 : f32
    %279 = vector.broadcast %cst_93 : f32 to vector<8x64xf32>
    %280 = arith.cmpf ogt, %276, %279 : vector<8x64xf32>
    %281 = arith.select %280, %17, %15 : vector<8x64xi1>, vector<8x64xf32>
    %282 = arith.addf %278, %281 : vector<8x64xf32>
    %cst_94 = arith.constant 0.899999976 : f32
    %283 = vector.broadcast %cst_94 : f32 to vector<8x64xf32>
    %284 = arith.mulf %283, %282 : vector<8x64xf32>
    %cst_95 = arith.constant 1.000000e+00 : f32
    %285 = vector.broadcast %cst_95 : f32 to vector<8x64xf32>
    %286 = arith.cmpf ogt, %282, %285 : vector<8x64xf32>
    %287 = arith.select %286, %17, %15 : vector<8x64xi1>, vector<8x64xf32>
    %288 = arith.addf %284, %287 : vector<8x64xf32>
    %cst_96 = arith.constant 0.899999976 : f32
    %289 = vector.broadcast %cst_96 : f32 to vector<8x64xf32>
    %290 = arith.mulf %289, %288 : vector<8x64xf32>
    %cst_97 = arith.constant 1.000000e+00 : f32
    %291 = vector.broadcast %cst_97 : f32 to vector<8x64xf32>
    %292 = arith.cmpf ogt, %288, %291 : vector<8x64xf32>
    %293 = arith.select %292, %17, %15 : vector<8x64xi1>, vector<8x64xf32>
    %294 = arith.addf %290, %293 : vector<8x64xf32>
    %cst_98 = arith.constant 0.899999976 : f32
    %295 = vector.broadcast %cst_98 : f32 to vector<8x64xf32>
    %296 = arith.mulf %295, %294 : vector<8x64xf32>
    %cst_99 = arith.constant 1.000000e+00 : f32
    %297 = vector.broadcast %cst_99 : f32 to vector<8x64xf32>
    %298 = arith.cmpf ogt, %294, %297 : vector<8x64xf32>
    %299 = arith.select %298, %17, %15 : vector<8x64xi1>, vector<8x64xf32>
    %300 = arith.addf %296, %299 : vector<8x64xf32>
    %cst_100 = arith.constant 0.899999976 : f32
    %301 = vector.broadcast %cst_100 : f32 to vector<8x64xf32>
    %302 = arith.mulf %301, %300 : vector<8x64xf32>
    %cst_101 = arith.constant 1.000000e+00 : f32
    %303 = vector.broadcast %cst_101 : f32 to vector<8x64xf32>
    %304 = arith.cmpf ogt, %300, %303 : vector<8x64xf32>
    %305 = arith.select %304, %17, %15 : vector<8x64xi1>, vector<8x64xf32>
    %306 = arith.addf %302, %305 : vector<8x64xf32>
    %cst_102 = arith.constant 0.899999976 : f32
    %307 = vector.broadcast %cst_102 : f32 to vector<8x64xf32>
    %308 = arith.mulf %307, %306 : vector<8x64xf32>
    %cst_103 = arith.constant 1.000000e+00 : f32
    %309 = vector.broadcast %cst_103 : f32 to vector<8x64xf32>
    %310 = arith.cmpf ogt, %306, %309 : vector<8x64xf32>
    %311 = arith.select %310, %17, %15 : vector<8x64xi1>, vector<8x64xf32>
    %312 = arith.addf %308, %311 : vector<8x64xf32>
    %cst_104 = arith.constant 0.899999976 : f32
    %313 = vector.broadcast %cst_104 : f32 to vector<8x64xf32>
    %314 = arith.mulf %313, %312 : vector<8x64xf32>
    %cst_105 = arith.constant 1.000000e+00 : f32
    %315 = vector.broadcast %cst_105 : f32 to vector<8x64xf32>
    %316 = arith.cmpf ogt, %312, %315 : vector<8x64xf32>
    %317 = arith.select %316, %17, %15 : vector<8x64xi1>, vector<8x64xf32>
    %318 = arith.addf %314, %317 : vector<8x64xf32>
    %cst_106 = arith.constant 0.899999976 : f32
    %319 = vector.broadcast %cst_106 : f32 to vector<8x64xf32>
    %320 = arith.mulf %319, %318 : vector<8x64xf32>
    %cst_107 = arith.constant 1.000000e+00 : f32
    %321 = vector.broadcast %cst_107 : f32 to vector<8x64xf32>
    %322 = arith.cmpf ogt, %318, %321 : vector<8x64xf32>
    %323 = arith.select %322, %17, %15 : vector<8x64xi1>, vector<8x64xf32>
    %324 = arith.addf %320, %323 : vector<8x64xf32>
    %cst_108 = arith.constant 0.899999976 : f32
    %325 = vector.broadcast %cst_108 : f32 to vector<8x64xf32>
    %326 = arith.mulf %325, %324 : vector<8x64xf32>
    %cst_109 = arith.constant 1.000000e+00 : f32
    %327 = vector.broadcast %cst_109 : f32 to vector<8x64xf32>
    %328 = arith.cmpf ogt, %324, %327 : vector<8x64xf32>
    %329 = arith.select %328, %17, %15 : vector<8x64xi1>, vector<8x64xf32>
    %330 = arith.addf %326, %329 : vector<8x64xf32>
    %cst_110 = arith.constant 0.899999976 : f32
    %331 = vector.broadcast %cst_110 : f32 to vector<8x64xf32>
    %332 = arith.mulf %331, %330 : vector<8x64xf32>
    %cst_111 = arith.constant 1.000000e+00 : f32
    %333 = vector.broadcast %cst_111 : f32 to vector<8x64xf32>
    %334 = arith.cmpf ogt, %330, %333 : vector<8x64xf32>
    %335 = arith.select %334, %17, %15 : vector<8x64xi1>, vector<8x64xf32>
    %336 = arith.addf %332, %335 : vector<8x64xf32>
    %cst_112 = arith.constant 0.899999976 : f32
    %337 = vector.broadcast %cst_112 : f32 to vector<8x64xf32>
    %338 = arith.mulf %337, %336 : vector<8x64xf32>
    %cst_113 = arith.constant 1.000000e+00 : f32
    %339 = vector.broadcast %cst_113 : f32 to vector<8x64xf32>
    %340 = arith.cmpf ogt, %336, %339 : vector<8x64xf32>
    %341 = arith.select %340, %17, %15 : vector<8x64xi1>, vector<8x64xf32>
    %342 = arith.addf %338, %341 : vector<8x64xf32>
    %cst_114 = arith.constant 0.899999976 : f32
    %343 = vector.broadcast %cst_114 : f32 to vector<8x64xf32>
    %344 = arith.mulf %343, %342 : vector<8x64xf32>
    %cst_115 = arith.constant 1.000000e+00 : f32
    %345 = vector.broadcast %cst_115 : f32 to vector<8x64xf32>
    %346 = arith.cmpf ogt, %342, %345 : vector<8x64xf32>
    %347 = arith.select %346, %17, %15 : vector<8x64xi1>, vector<8x64xf32>
    %348 = arith.addf %344, %347 : vector<8x64xf32>
    %cst_116 = arith.constant 0.899999976 : f32
    %349 = vector.broadcast %cst_116 : f32 to vector<8x64xf32>
    %350 = arith.mulf %349, %348 : vector<8x64xf32>
    %cst_117 = arith.constant 1.000000e+00 : f32
    %351 = vector.broadcast %cst_117 : f32 to vector<8x64xf32>
    %352 = arith.cmpf ogt, %348, %351 : vector<8x64xf32>
    %353 = arith.select %352, %17, %15 : vector<8x64xi1>, vector<8x64xf32>
    %354 = arith.addf %350, %353 : vector<8x64xf32>
    %cst_118 = arith.constant 0.899999976 : f32
    %355 = vector.broadcast %cst_118 : f32 to vector<8x64xf32>
    %356 = arith.mulf %355, %354 : vector<8x64xf32>
    %cst_119 = arith.constant 1.000000e+00 : f32
    %357 = vector.broadcast %cst_119 : f32 to vector<8x64xf32>
    %358 = arith.cmpf ogt, %354, %357 : vector<8x64xf32>
    %359 = arith.select %358, %17, %15 : vector<8x64xi1>, vector<8x64xf32>
    %360 = arith.addf %356, %359 : vector<8x64xf32>
    %cst_120 = arith.constant 0.899999976 : f32
    %361 = vector.broadcast %cst_120 : f32 to vector<8x64xf32>
    %362 = arith.mulf %361, %360 : vector<8x64xf32>
    %cst_121 = arith.constant 1.000000e+00 : f32
    %363 = vector.broadcast %cst_121 : f32 to vector<8x64xf32>
    %364 = arith.cmpf ogt, %360, %363 : vector<8x64xf32>
    %365 = arith.select %364, %17, %15 : vector<8x64xi1>, vector<8x64xf32>
    %366 = arith.addf %362, %365 : vector<8x64xf32>
    %cst_122 = arith.constant 0.899999976 : f32
    %367 = vector.broadcast %cst_122 : f32 to vector<8x64xf32>
    %368 = arith.mulf %367, %366 : vector<8x64xf32>
    %cst_123 = arith.constant 1.000000e+00 : f32
    %369 = vector.broadcast %cst_123 : f32 to vector<8x64xf32>
    %370 = arith.cmpf ogt, %366, %369 : vector<8x64xf32>
    %371 = arith.select %370, %17, %15 : vector<8x64xi1>, vector<8x64xf32>
    %372 = arith.addf %368, %371 : vector<8x64xf32>
    %cst_124 = arith.constant 0.899999976 : f32
    %373 = vector.broadcast %cst_124 : f32 to vector<8x64xf32>
    %374 = arith.mulf %373, %372 : vector<8x64xf32>
    %cst_125 = arith.constant 1.000000e+00 : f32
    %375 = vector.broadcast %cst_125 : f32 to vector<8x64xf32>
    %376 = arith.cmpf ogt, %372, %375 : vector<8x64xf32>
    %377 = arith.select %376, %17, %15 : vector<8x64xi1>, vector<8x64xf32>
    %378 = arith.addf %374, %377 : vector<8x64xf32>
    %cst_126 = arith.constant 0.899999976 : f32
    %379 = vector.broadcast %cst_126 : f32 to vector<8x64xf32>
    %380 = arith.mulf %379, %378 : vector<8x64xf32>
    %cst_127 = arith.constant 1.000000e+00 : f32
    %381 = vector.broadcast %cst_127 : f32 to vector<8x64xf32>
    %382 = arith.cmpf ogt, %378, %381 : vector<8x64xf32>
    %383 = arith.select %382, %17, %15 : vector<8x64xi1>, vector<8x64xf32>
    %384 = arith.addf %380, %383 : vector<8x64xf32>
    %cst_128 = arith.constant 0.899999976 : f32
    %385 = vector.broadcast %cst_128 : f32 to vector<8x64xf32>
    %386 = arith.mulf %385, %384 : vector<8x64xf32>
    %cst_129 = arith.constant 1.000000e+00 : f32
    %387 = vector.broadcast %cst_129 : f32 to vector<8x64xf32>
    %388 = arith.cmpf ogt, %384, %387 : vector<8x64xf32>
    %389 = arith.select %388, %17, %15 : vector<8x64xi1>, vector<8x64xf32>
    %390 = arith.addf %386, %389 : vector<8x64xf32>
    %cst_130 = arith.constant 0.899999976 : f32
    %391 = vector.broadcast %cst_130 : f32 to vector<8x64xf32>
    %392 = arith.mulf %391, %390 : vector<8x64xf32>
    %cst_131 = arith.constant 1.000000e+00 : f32
    %393 = vector.broadcast %cst_131 : f32 to vector<8x64xf32>
    %394 = arith.cmpf ogt, %390, %393 : vector<8x64xf32>
    %395 = arith.select %394, %17, %15 : vector<8x64xi1>, vector<8x64xf32>
    %396 = arith.addf %392, %395 : vector<8x64xf32>
    %cst_132 = arith.constant 0.899999976 : f32
    %397 = vector.broadcast %cst_132 : f32 to vector<8x64xf32>
    %398 = arith.mulf %397, %396 : vector<8x64xf32>
    %cst_133 = arith.constant 1.000000e+00 : f32
    %399 = vector.broadcast %cst_133 : f32 to vector<8x64xf32>
    %400 = arith.cmpf ogt, %396, %399 : vector<8x64xf32>
    %401 = arith.select %400, %17, %15 : vector<8x64xi1>, vector<8x64xf32>
    %402 = arith.addf %398, %401 : vector<8x64xf32>
    %cst_134 = arith.constant 0.899999976 : f32
    %403 = vector.broadcast %cst_134 : f32 to vector<8x64xf32>
    %404 = arith.mulf %403, %402 : vector<8x64xf32>
    %cst_135 = arith.constant 1.000000e+00 : f32
    %405 = vector.broadcast %cst_135 : f32 to vector<8x64xf32>
    %406 = arith.cmpf ogt, %402, %405 : vector<8x64xf32>
    %407 = arith.select %406, %17, %15 : vector<8x64xi1>, vector<8x64xf32>
    %408 = arith.addf %404, %407 : vector<8x64xf32>
    %cst_136 = arith.constant 0.899999976 : f32
    %409 = vector.broadcast %cst_136 : f32 to vector<8x64xf32>
    %410 = arith.mulf %409, %408 : vector<8x64xf32>
    %cst_137 = arith.constant 1.000000e+00 : f32
    %411 = vector.broadcast %cst_137 : f32 to vector<8x64xf32>
    %412 = arith.cmpf ogt, %408, %411 : vector<8x64xf32>
    %413 = arith.select %412, %17, %15 : vector<8x64xi1>, vector<8x64xf32>
    %414 = arith.addf %410, %413 : vector<8x64xf32>
    %cst_138 = arith.constant 0.899999976 : f32
    %415 = vector.broadcast %cst_138 : f32 to vector<8x64xf32>
    %416 = arith.mulf %415, %414 : vector<8x64xf32>
    %cst_139 = arith.constant 1.000000e+00 : f32
    %417 = vector.broadcast %cst_139 : f32 to vector<8x64xf32>
    %418 = arith.cmpf ogt, %414, %417 : vector<8x64xf32>
    %419 = arith.select %418, %17, %15 : vector<8x64xi1>, vector<8x64xf32>
    %420 = arith.addf %416, %419 : vector<8x64xf32>
    %cst_140 = arith.constant 0.899999976 : f32
    %421 = vector.broadcast %cst_140 : f32 to vector<8x64xf32>
    %422 = arith.mulf %421, %420 : vector<8x64xf32>
    %cst_141 = arith.constant 1.000000e+00 : f32
    %423 = vector.broadcast %cst_141 : f32 to vector<8x64xf32>
    %424 = arith.cmpf ogt, %420, %423 : vector<8x64xf32>
    %425 = arith.select %424, %17, %15 : vector<8x64xi1>, vector<8x64xf32>
    %426 = arith.addf %422, %425 : vector<8x64xf32>
    %cst_142 = arith.constant 0.899999976 : f32
    %427 = vector.broadcast %cst_142 : f32 to vector<8x64xf32>
    %428 = arith.mulf %427, %426 : vector<8x64xf32>
    %cst_143 = arith.constant 1.000000e+00 : f32
    %429 = vector.broadcast %cst_143 : f32 to vector<8x64xf32>
    %430 = arith.cmpf ogt, %426, %429 : vector<8x64xf32>
    %431 = arith.select %430, %17, %15 : vector<8x64xi1>, vector<8x64xf32>
    %432 = arith.addf %428, %431 : vector<8x64xf32>
    %cst_144 = arith.constant 0.899999976 : f32
    %433 = vector.broadcast %cst_144 : f32 to vector<8x64xf32>
    %434 = arith.mulf %433, %432 : vector<8x64xf32>
    %cst_145 = arith.constant 1.000000e+00 : f32
    %435 = vector.broadcast %cst_145 : f32 to vector<8x64xf32>
    %436 = arith.cmpf ogt, %432, %435 : vector<8x64xf32>
    %437 = arith.select %436, %17, %15 : vector<8x64xi1>, vector<8x64xf32>
    %438 = arith.addf %434, %437 : vector<8x64xf32>
    %cst_146 = arith.constant 0.899999976 : f32
    %439 = vector.broadcast %cst_146 : f32 to vector<8x64xf32>
    %440 = arith.mulf %439, %438 : vector<8x64xf32>
    %cst_147 = arith.constant 1.000000e+00 : f32
    %441 = vector.broadcast %cst_147 : f32 to vector<8x64xf32>
    %442 = arith.cmpf ogt, %438, %441 : vector<8x64xf32>
    %443 = arith.select %442, %17, %15 : vector<8x64xi1>, vector<8x64xf32>
    %444 = arith.addf %440, %443 : vector<8x64xf32>
    %cst_148 = arith.constant 0.899999976 : f32
    %445 = vector.broadcast %cst_148 : f32 to vector<8x64xf32>
    %446 = arith.mulf %445, %444 : vector<8x64xf32>
    %cst_149 = arith.constant 1.000000e+00 : f32
    %447 = vector.broadcast %cst_149 : f32 to vector<8x64xf32>
    %448 = arith.cmpf ogt, %444, %447 : vector<8x64xf32>
    %449 = arith.select %448, %17, %15 : vector<8x64xi1>, vector<8x64xf32>
    %450 = arith.addf %446, %449 : vector<8x64xf32>
    %cst_150 = arith.constant 0.899999976 : f32
    %451 = vector.broadcast %cst_150 : f32 to vector<8x64xf32>
    %452 = arith.mulf %451, %450 : vector<8x64xf32>
    %cst_151 = arith.constant 1.000000e+00 : f32
    %453 = vector.broadcast %cst_151 : f32 to vector<8x64xf32>
    %454 = arith.cmpf ogt, %450, %453 : vector<8x64xf32>
    %455 = arith.select %454, %17, %15 : vector<8x64xi1>, vector<8x64xf32>
    %456 = arith.addf %452, %455 : vector<8x64xf32>
    %cst_152 = arith.constant 0.899999976 : f32
    %457 = vector.broadcast %cst_152 : f32 to vector<8x64xf32>
    %458 = arith.mulf %457, %456 : vector<8x64xf32>
    %cst_153 = arith.constant 1.000000e+00 : f32
    %459 = vector.broadcast %cst_153 : f32 to vector<8x64xf32>
    %460 = arith.cmpf ogt, %456, %459 : vector<8x64xf32>
    %461 = arith.select %460, %17, %15 : vector<8x64xi1>, vector<8x64xf32>
    %462 = arith.addf %458, %461 : vector<8x64xf32>
    %cst_154 = arith.constant 0.899999976 : f32
    %463 = vector.broadcast %cst_154 : f32 to vector<8x64xf32>
    %464 = arith.mulf %463, %462 : vector<8x64xf32>
    %cst_155 = arith.constant 1.000000e+00 : f32
    %465 = vector.broadcast %cst_155 : f32 to vector<8x64xf32>
    %466 = arith.cmpf ogt, %462, %465 : vector<8x64xf32>
    %467 = arith.select %466, %17, %15 : vector<8x64xi1>, vector<8x64xf32>
    %468 = arith.addf %464, %467 : vector<8x64xf32>
    %cst_156 = arith.constant 0.899999976 : f32
    %469 = vector.broadcast %cst_156 : f32 to vector<8x64xf32>
    %470 = arith.mulf %469, %468 : vector<8x64xf32>
    %cst_157 = arith.constant 1.000000e+00 : f32
    %471 = vector.broadcast %cst_157 : f32 to vector<8x64xf32>
    %472 = arith.cmpf ogt, %468, %471 : vector<8x64xf32>
    %473 = arith.select %472, %17, %15 : vector<8x64xi1>, vector<8x64xf32>
    %474 = arith.addf %470, %473 : vector<8x64xf32>
    %cst_158 = arith.constant 0.899999976 : f32
    %475 = vector.broadcast %cst_158 : f32 to vector<8x64xf32>
    %476 = arith.mulf %475, %474 : vector<8x64xf32>
    %cst_159 = arith.constant 1.000000e+00 : f32
    %477 = vector.broadcast %cst_159 : f32 to vector<8x64xf32>
    %478 = arith.cmpf ogt, %474, %477 : vector<8x64xf32>
    %479 = arith.select %478, %17, %15 : vector<8x64xi1>, vector<8x64xf32>
    %480 = arith.addf %476, %479 : vector<8x64xf32>
    %cst_160 = arith.constant 0.899999976 : f32
    %481 = vector.broadcast %cst_160 : f32 to vector<8x64xf32>
    %482 = arith.mulf %481, %480 : vector<8x64xf32>
    %cst_161 = arith.constant 1.000000e+00 : f32
    %483 = vector.broadcast %cst_161 : f32 to vector<8x64xf32>
    %484 = arith.cmpf ogt, %480, %483 : vector<8x64xf32>
    %485 = arith.select %484, %17, %15 : vector<8x64xi1>, vector<8x64xf32>
    %486 = arith.addf %482, %485 : vector<8x64xf32>
    %cst_162 = arith.constant 0.899999976 : f32
    %487 = vector.broadcast %cst_162 : f32 to vector<8x64xf32>
    %488 = arith.mulf %487, %486 : vector<8x64xf32>
    %cst_163 = arith.constant 1.000000e+00 : f32
    %489 = vector.broadcast %cst_163 : f32 to vector<8x64xf32>
    %490 = arith.cmpf ogt, %486, %489 : vector<8x64xf32>
    %491 = arith.select %490, %17, %15 : vector<8x64xi1>, vector<8x64xf32>
    %492 = arith.addf %488, %491 : vector<8x64xf32>
    %cst_164 = arith.constant 0.899999976 : f32
    %493 = vector.broadcast %cst_164 : f32 to vector<8x64xf32>
    %494 = arith.mulf %493, %492 : vector<8x64xf32>
    %cst_165 = arith.constant 1.000000e+00 : f32
    %495 = vector.broadcast %cst_165 : f32 to vector<8x64xf32>
    %496 = arith.cmpf ogt, %492, %495 : vector<8x64xf32>
    %497 = arith.select %496, %17, %15 : vector<8x64xi1>, vector<8x64xf32>
    %498 = arith.addf %494, %497 : vector<8x64xf32>
    %cst_166 = arith.constant 0.899999976 : f32
    %499 = vector.broadcast %cst_166 : f32 to vector<8x64xf32>
    %500 = arith.mulf %499, %498 : vector<8x64xf32>
    %cst_167 = arith.constant 1.000000e+00 : f32
    %501 = vector.broadcast %cst_167 : f32 to vector<8x64xf32>
    %502 = arith.cmpf ogt, %498, %501 : vector<8x64xf32>
    %503 = arith.select %502, %17, %15 : vector<8x64xi1>, vector<8x64xf32>
    %504 = arith.addf %500, %503 : vector<8x64xf32>
    %cst_168 = arith.constant 0.899999976 : f32
    %505 = vector.broadcast %cst_168 : f32 to vector<8x64xf32>
    %506 = arith.mulf %505, %504 : vector<8x64xf32>
    %cst_169 = arith.constant 1.000000e+00 : f32
    %507 = vector.broadcast %cst_169 : f32 to vector<8x64xf32>
    %508 = arith.cmpf ogt, %504, %507 : vector<8x64xf32>
    %509 = arith.select %508, %17, %15 : vector<8x64xi1>, vector<8x64xf32>
    %510 = arith.addf %506, %509 : vector<8x64xf32>
    %cst_170 = arith.constant 0.899999976 : f32
    %511 = vector.broadcast %cst_170 : f32 to vector<8x64xf32>
    %512 = arith.mulf %511, %510 : vector<8x64xf32>
    %cst_171 = arith.constant 1.000000e+00 : f32
    %513 = vector.broadcast %cst_171 : f32 to vector<8x64xf32>
    %514 = arith.cmpf ogt, %510, %513 : vector<8x64xf32>
    %515 = arith.select %514, %17, %15 : vector<8x64xi1>, vector<8x64xf32>
    %516 = arith.addf %512, %515 : vector<8x64xf32>
    %cst_172 = arith.constant 0.899999976 : f32
    %517 = vector.broadcast %cst_172 : f32 to vector<8x64xf32>
    %518 = arith.mulf %517, %516 : vector<8x64xf32>
    %cst_173 = arith.constant 1.000000e+00 : f32
    %519 = vector.broadcast %cst_173 : f32 to vector<8x64xf32>
    %520 = arith.cmpf ogt, %516, %519 : vector<8x64xf32>
    %521 = arith.select %520, %17, %15 : vector<8x64xi1>, vector<8x64xf32>
    %522 = arith.addf %518, %521 : vector<8x64xf32>
    %cst_174 = arith.constant 0.899999976 : f32
    %523 = vector.broadcast %cst_174 : f32 to vector<8x64xf32>
    %524 = arith.mulf %523, %522 : vector<8x64xf32>
    %cst_175 = arith.constant 1.000000e+00 : f32
    %525 = vector.broadcast %cst_175 : f32 to vector<8x64xf32>
    %526 = arith.cmpf ogt, %522, %525 : vector<8x64xf32>
    %527 = arith.select %526, %17, %15 : vector<8x64xi1>, vector<8x64xf32>
    %528 = arith.addf %524, %527 : vector<8x64xf32>
    %cst_176 = arith.constant 0.899999976 : f32
    %529 = vector.broadcast %cst_176 : f32 to vector<8x64xf32>
    %530 = arith.mulf %529, %528 : vector<8x64xf32>
    %cst_177 = arith.constant 1.000000e+00 : f32
    %531 = vector.broadcast %cst_177 : f32 to vector<8x64xf32>
    %532 = arith.cmpf ogt, %528, %531 : vector<8x64xf32>
    %533 = arith.select %532, %17, %15 : vector<8x64xi1>, vector<8x64xf32>
    %534 = arith.addf %530, %533 : vector<8x64xf32>
    %cst_178 = arith.constant 0.899999976 : f32
    %535 = vector.broadcast %cst_178 : f32 to vector<8x64xf32>
    %536 = arith.mulf %535, %534 : vector<8x64xf32>
    %cst_179 = arith.constant 1.000000e+00 : f32
    %537 = vector.broadcast %cst_179 : f32 to vector<8x64xf32>
    %538 = arith.cmpf ogt, %534, %537 : vector<8x64xf32>
    %539 = arith.select %538, %17, %15 : vector<8x64xi1>, vector<8x64xf32>
    %540 = arith.addf %536, %539 : vector<8x64xf32>
    %cst_180 = arith.constant 0.899999976 : f32
    %541 = vector.broadcast %cst_180 : f32 to vector<8x64xf32>
    %542 = arith.mulf %541, %540 : vector<8x64xf32>
    %cst_181 = arith.constant 1.000000e+00 : f32
    %543 = vector.broadcast %cst_181 : f32 to vector<8x64xf32>
    %544 = arith.cmpf ogt, %540, %543 : vector<8x64xf32>
    %545 = arith.select %544, %17, %15 : vector<8x64xi1>, vector<8x64xf32>
    %546 = arith.addf %542, %545 : vector<8x64xf32>
    %cst_182 = arith.constant 0.899999976 : f32
    %547 = vector.broadcast %cst_182 : f32 to vector<8x64xf32>
    %548 = arith.mulf %547, %546 : vector<8x64xf32>
    %cst_183 = arith.constant 1.000000e+00 : f32
    %549 = vector.broadcast %cst_183 : f32 to vector<8x64xf32>
    %550 = arith.cmpf ogt, %546, %549 : vector<8x64xf32>
    %551 = arith.select %550, %17, %15 : vector<8x64xi1>, vector<8x64xf32>
    %552 = arith.addf %548, %551 : vector<8x64xf32>
    %cst_184 = arith.constant 0.899999976 : f32
    %553 = vector.broadcast %cst_184 : f32 to vector<8x64xf32>
    %554 = arith.mulf %553, %552 : vector<8x64xf32>
    %cst_185 = arith.constant 1.000000e+00 : f32
    %555 = vector.broadcast %cst_185 : f32 to vector<8x64xf32>
    %556 = arith.cmpf ogt, %552, %555 : vector<8x64xf32>
    %557 = arith.select %556, %17, %15 : vector<8x64xi1>, vector<8x64xf32>
    %558 = arith.addf %554, %557 : vector<8x64xf32>
    %cst_186 = arith.constant 0.899999976 : f32
    %559 = vector.broadcast %cst_186 : f32 to vector<8x64xf32>
    %560 = arith.mulf %559, %558 : vector<8x64xf32>
    %cst_187 = arith.constant 1.000000e+00 : f32
    %561 = vector.broadcast %cst_187 : f32 to vector<8x64xf32>
    %562 = arith.cmpf ogt, %558, %561 : vector<8x64xf32>
    %563 = arith.select %562, %17, %15 : vector<8x64xi1>, vector<8x64xf32>
    %564 = arith.addf %560, %563 : vector<8x64xf32>
    %cst_188 = arith.constant 0.899999976 : f32
    %565 = vector.broadcast %cst_188 : f32 to vector<8x64xf32>
    %566 = arith.mulf %565, %564 : vector<8x64xf32>
    %cst_189 = arith.constant 1.000000e+00 : f32
    %567 = vector.broadcast %cst_189 : f32 to vector<8x64xf32>
    %568 = arith.cmpf ogt, %564, %567 : vector<8x64xf32>
    %569 = arith.select %568, %17, %15 : vector<8x64xi1>, vector<8x64xf32>
    %570 = arith.addf %566, %569 : vector<8x64xf32>
    %cst_190 = arith.constant 0.899999976 : f32
    %571 = vector.broadcast %cst_190 : f32 to vector<8x64xf32>
    %572 = arith.mulf %571, %570 : vector<8x64xf32>
    %cst_191 = arith.constant 1.000000e+00 : f32
    %573 = vector.broadcast %cst_191 : f32 to vector<8x64xf32>
    %574 = arith.cmpf ogt, %570, %573 : vector<8x64xf32>
    %575 = arith.select %574, %17, %15 : vector<8x64xi1>, vector<8x64xf32>
    %576 = arith.addf %572, %575 : vector<8x64xf32>
    %cst_192 = arith.constant 0.899999976 : f32
    %577 = vector.broadcast %cst_192 : f32 to vector<8x64xf32>
    %578 = arith.mulf %577, %576 : vector<8x64xf32>
    %cst_193 = arith.constant 1.000000e+00 : f32
    %579 = vector.broadcast %cst_193 : f32 to vector<8x64xf32>
    %580 = arith.cmpf ogt, %576, %579 : vector<8x64xf32>
    %581 = arith.select %580, %17, %15 : vector<8x64xi1>, vector<8x64xf32>
    %582 = arith.addf %578, %581 : vector<8x64xf32>
    %cst_194 = arith.constant 0.899999976 : f32
    %583 = vector.broadcast %cst_194 : f32 to vector<8x64xf32>
    %584 = arith.mulf %583, %582 : vector<8x64xf32>
    %cst_195 = arith.constant 1.000000e+00 : f32
    %585 = vector.broadcast %cst_195 : f32 to vector<8x64xf32>
    %586 = arith.cmpf ogt, %582, %585 : vector<8x64xf32>
    %587 = arith.select %586, %17, %15 : vector<8x64xi1>, vector<8x64xf32>
    %588 = arith.addf %584, %587 : vector<8x64xf32>
    %cst_196 = arith.constant 0.899999976 : f32
    %589 = vector.broadcast %cst_196 : f32 to vector<8x64xf32>
    %590 = arith.mulf %589, %588 : vector<8x64xf32>
    %cst_197 = arith.constant 1.000000e+00 : f32
    %591 = vector.broadcast %cst_197 : f32 to vector<8x64xf32>
    %592 = arith.cmpf ogt, %588, %591 : vector<8x64xf32>
    %593 = arith.select %592, %17, %15 : vector<8x64xi1>, vector<8x64xf32>
    %594 = arith.addf %590, %593 : vector<8x64xf32>
    %cst_198 = arith.constant 0.899999976 : f32
    %595 = vector.broadcast %cst_198 : f32 to vector<8x64xf32>
    %596 = arith.mulf %595, %594 : vector<8x64xf32>
    %cst_199 = arith.constant 1.000000e+00 : f32
    %597 = vector.broadcast %cst_199 : f32 to vector<8x64xf32>
    %598 = arith.cmpf ogt, %594, %597 : vector<8x64xf32>
    %599 = arith.select %598, %17, %15 : vector<8x64xi1>, vector<8x64xf32>
    %600 = arith.addf %596, %599 : vector<8x64xf32>
    %cst_200 = arith.constant 0.899999976 : f32
    %601 = vector.broadcast %cst_200 : f32 to vector<8x64xf32>
    %602 = arith.mulf %601, %600 : vector<8x64xf32>
    %cst_201 = arith.constant 1.000000e+00 : f32
    %603 = vector.broadcast %cst_201 : f32 to vector<8x64xf32>
    %604 = arith.cmpf ogt, %600, %603 : vector<8x64xf32>
    %605 = arith.select %604, %17, %15 : vector<8x64xi1>, vector<8x64xf32>
    %606 = arith.addf %602, %605 : vector<8x64xf32>
    %cst_202 = arith.constant 0.899999976 : f32
    %607 = vector.broadcast %cst_202 : f32 to vector<8x64xf32>
    %608 = arith.mulf %607, %606 : vector<8x64xf32>
    %cst_203 = arith.constant 1.000000e+00 : f32
    %609 = vector.broadcast %cst_203 : f32 to vector<8x64xf32>
    %610 = arith.cmpf ogt, %606, %609 : vector<8x64xf32>
    %611 = arith.select %610, %17, %15 : vector<8x64xi1>, vector<8x64xf32>
    %612 = arith.addf %608, %611 : vector<8x64xf32>
    %cst_204 = arith.constant 0.899999976 : f32
    %613 = vector.broadcast %cst_204 : f32 to vector<8x64xf32>
    %614 = arith.mulf %613, %612 : vector<8x64xf32>
    %cst_205 = arith.constant 1.000000e+00 : f32
    %615 = vector.broadcast %cst_205 : f32 to vector<8x64xf32>
    %616 = arith.cmpf ogt, %612, %615 : vector<8x64xf32>
    %617 = arith.select %616, %17, %15 : vector<8x64xi1>, vector<8x64xf32>
    %618 = arith.addf %614, %617 : vector<8x64xf32>
    %c0_206 = arith.constant 0 : index
    %c0_207 = arith.constant 0 : index
    %619 = vector.load %arg3[%c0_206, %c0_207] : memref<1x64xf32, #tpu.memory_space<vmem>>, vector<1x64xf32>
    %cst_208 = arith.constant 1.000000e+00 : f32
    %620 = vector.broadcast %cst_208 : f32 to vector<8x64xf32>
    %621 = arith.cmpf ogt, %618, %620 : vector<8x64xf32>
    %622 = vector.shape_cast %619 : vector<1x64xf32> to vector<1x64xf32>
    %623 = vector.broadcast %622 : vector<1x64xf32> to vector<8x64xf32>
    %cst_209 = arith.constant 0.000000e+00 : f32
    %624 = vector.broadcast %cst_209 : f32 to vector<8x64xf32>
    %625 = arith.select %621, %623, %624 : vector<8x64xi1>, vector<8x64xf32>
    %cst_210 = arith.constant dense<0.000000e+00> : vector<8xf32>
    %626 = vector.multi_reduction <add>, %625, %cst_210 [1] : vector<8x64xf32> to vector<8xf32>
    %627 = vector.shape_cast %626 : vector<8xf32> to vector<8x1xf32>
    %c0_211 = arith.constant 0 : index
    %c0_212 = arith.constant 0 : index
    %628 = vector.load %arg4[%c0_211, %c0_212] : memref<1x1xf32, #tpu.memory_space<vmem>>, vector<1x1xf32>
    %629 = vector.broadcast %628 : vector<1x1xf32> to vector<8x1xf32>
    %630 = arith.addf %627, %629 : vector<8x1xf32>
    %c0_213 = arith.constant 0 : index
    %c0_214 = arith.constant 0 : index
    %631 = vector.load %arg5[%c0_213, %c0_214] : memref<8x1xf32, #tpu.memory_space<vmem>>, vector<8x1xf32>
    tpu.vector_store %arg5[%c0_213, %c0_214], %630 {strides = array<i32>} : memref<8x1xf32, #tpu.memory_space<vmem>>, vector<8x1xf32>,
    return
  }
}

</mosaic_0001>

<bundles_post_ra>
// kernel: tpu_custom_call.1
= control target key start
LH: loop header
LB: loop body
LE: loop exit
PB: predicated region body
PF: predicated region fallthrough
CT: control target
= control target key end

     0   :  { %v487_v0 = vmov 0   ;;  %v488_v2 = vmov 1   ;;  %v30_v3 = vlaneseq  ;;  %s742_s0 = inlined_call_operand.vmem [shape: f32[8,2], index: 0, kind: input, shape index: {}]   ;;  %s743_s1 = inlined_call_operand.vmem [shape: f32[2,64], index: 1, kind: input, shape index: {}]   ;;  %s744_s2 = inlined_call_operand.vmem [shape: f32[1,64], index: 2, kind: input, shape index: {}]   ;;  %s745_s4 = inlined_call_operand.<no memory space> [shape: f32[1,1], index: 4, kind: input, shape index: {}]   ;;  %s746_s3 = inlined_call_operand.vmem [shape: f32[1,64], index: 3, kind: input, shape index: {}]   ;;  %s747_s5 = inlined_call_operand.vmem [shape: f32[8,1], index: 5, kind: output, shape index: {}]  }
   0x1   :  { %485 = vset.pattern.permute.xlu0 %v487_v0  ;;  %v22_v1 = vld [vmem:[%s742_s0] sm:$0xff] }
   0x2   :  { %27 = vperm.xlu0 %485, %v22_v1   ;;  %v31_v4 = vshrl.u32 %v30_v3, 7  ;;  %v23_v6 = vld [vmem:[%s743_s1] sm:$0x3] }
   0x3   :  { %v479_v12 = vld [vmem:[%s744_s2] ss:$0 sm:$0xff] }
   0x4   :  { %v32_v5 = vsub.s32 0, %v31_v4  ;;  %v48_v8 = vsub.s32 1, %v31_v4 }
   0x6   :  { %486 = vset.pattern.permute.xlu0 %v488_v2  ;;  %v33_v7 = vrot.slane %v23_v6, %v32_v5  ;;  %v49_v11 = vrot.slane %v23_v6, %v48_v8 }
   0x7   :  { %43 = vperm.xlu0 %486, %v22_v1  }
  0x81   :  { %v28_v9 = vpop.permute.xlu0 %27 }
  0x82   :  { %v34_v10 = vmul.f32 %v33_v7, %v28_v9 }
  0x84   :  { %v41_v14 = vadd.f32 %v479_v12, %v34_v10 }
  0x86   :  { %v44_v13 = vpop.permute.xlu0 %43 }
  0x87   :  { %v50_v15 = vmul.f32 %v49_v11, %v44_v13 }
  0x89   :  { %v528_v16 = vadd.f32 %v50_v15, %v41_v14 }
  0x8b   :  { %v531_v17 = vadd.f32 -1.0, %v528_v16  ;;  %v56_v18 = vmul.f32 0.9, %v528_v16  ;;  %vm57_vm0 = vcmp.gt.f32.partialorder %v528_v16, 1.0 }
  0x8d   :  { %v58_v19 = vsel %vm57_vm0, %v531_v17, %v528_v16 }
  0x8e   :  { %v59_v20 = vadd.f32 %v58_v19, %v56_v18 }
  0x90   :  { %v60_v21 = vmul.f32 0.9, %v59_v20  ;;  %vm61_vm1 = vcmp.gt.f32.partialorder %v59_v20, 1.0 }
  0x91   :  { %v62_v22 = vsel %vm61_vm1, %v531_v17, %v528_v16 }
  0x92   :  { %v63_v23 = vadd.f32 %v62_v22, %v60_v21 }
  0x94   :  { %v64_v24 = vmul.f32 0.9, %v63_v23  ;;  %vm65_vm2 = vcmp.gt.f32.partialorder %v63_v23, 1.0 }
  0x95   :  { %v66_v25 = vsel %vm65_vm2, %v531_v17, %v528_v16 }
  0x96   :  { %v67_v26 = vadd.f32 %v66_v25, %v64_v24 }
  0x98   :  { %v68_v27 = vmul.f32 0.9, %v67_v26  ;;  %vm69_vm3 = vcmp.gt.f32.partialorder %v67_v26, 1.0 }
  0x99   :  { %v70_v28 = vsel %vm69_vm3, %v531_v17, %v528_v16 }
  0x9a   :  { %v71_v29 = vadd.f32 %v70_v28, %v68_v27 }
  0x9c   :  { %v72_v30 = vmul.f32 0.9, %v71_v29  ;;  %vm73_vm4 = vcmp.gt.f32.partialorder %v71_v29, 1.0 }
  0x9d   :  { %v74_v31 = vsel %vm73_vm4, %v531_v17, %v528_v16 }
  0x9e   :  { %v75_v32 = vadd.f32 %v74_v31, %v72_v30 }
  0xa0   :  { %v76_v33 = vmul.f32 0.9, %v75_v32  ;;  %vm77_vm5 = vcmp.gt.f32.partialorder %v75_v32, 1.0 }
  0xa1   :  { %v78_v34 = vsel %vm77_vm5, %v531_v17, %v528_v16 }
  0xa2   :  { %v79_v35 = vadd.f32 %v78_v34, %v76_v33 }
  0xa4   :  { %v80_v36 = vmul.f32 0.9, %v79_v35  ;;  %vm81_vm6 = vcmp.gt.f32.partialorder %v79_v35, 1.0 }
  0xa5   :  { %v82_v37 = vsel %vm81_vm6, %v531_v17, %v528_v16 }
  0xa6   :  { %v83_v38 = vadd.f32 %v82_v37, %v80_v36 }
  0xa8   :  { %v84_v39 = vmul.f32 0.9, %v83_v38  ;;  %vm85_vm7 = vcmp.gt.f32.partialorder %v83_v38, 1.0 }
  0xa9   :  { %v86_v40 = vsel %vm85_vm7, %v531_v17, %v528_v16 }
  0xaa   :  { %v87_v41 = vadd.f32 %v86_v40, %v84_v39 }
  0xac   :  { %v88_v42 = vmul.f32 0.9, %v87_v41  ;;  %vm89_vm8 = vcmp.gt.f32.partialorder %v87_v41, 1.0 }
  0xad   :  { %v90_v43 = vsel %vm89_vm8, %v531_v17, %v528_v16 }
  0xae   :  { %v91_v44 = vadd.f32 %v90_v43, %v88_v42 }
  0xb0   :  { %v92_v45 = vmul.f32 0.9, %v91_v44  ;;  %vm93_vm9 = vcmp.gt.f32.partialorder %v91_v44, 1.0 }
  0xb1   :  { %v94_v46 = vsel %vm93_vm9, %v531_v17, %v528_v16 }
  0xb2   :  { %v95_v47 = vadd.f32 %v94_v46, %v92_v45 }
  0xb4   :  { %v96_v48 = vmul.f32 0.9, %v95_v47  ;;  %vm97_vm10 = vcmp.gt.f32.partialorder %v95_v47, 1.0 }
  0xb5   :  { %v98_v49 = vsel %vm97_vm10, %v531_v17, %v528_v16 }
  0xb6   :  { %v99_v50 = vadd.f32 %v98_v49, %v96_v48 }
  0xb8   :  { %v100_v51 = vmul.f32 0.9, %v99_v50  ;;  %vm101_vm11 = vcmp.gt.f32.partialorder %v99_v50, 1.0 }
  0xb9   :  { %v102_v52 = vsel %vm101_vm11, %v531_v17, %v528_v16 }
  0xba   :  { %v103_v53 = vadd.f32 %v102_v52, %v100_v51 }
  0xbc   :  { %v104_v54 = vmul.f32 0.9, %v103_v53  ;;  %vm105_vm12 = vcmp.gt.f32.partialorder %v103_v53, 1.0 }
  0xbd   :  { %v106_v55 = vsel %vm105_vm12, %v531_v17, %v528_v16 }
  0xbe   :  { %v107_v56 = vadd.f32 %v106_v55, %v104_v54 }
  0xc0   :  { %v108_v57 = vmul.f32 0.9, %v107_v56  ;;  %vm109_vm13 = vcmp.gt.f32.partialorder %v107_v56, 1.0 }
  0xc1   :  { %v110_v58 = vsel %vm109_vm13, %v531_v17, %v528_v16 }
  0xc2   :  { %v111_v59 = vadd.f32 %v110_v58, %v108_v57 }
  0xc4   :  { %v112_v60 = vmul.f32 0.9, %v111_v59  ;;  %vm113_vm14 = vcmp.gt.f32.partialorder %v111_v59, 1.0 }
  0xc5   :  { %v114_v61 = vsel %vm113_vm14, %v531_v17, %v528_v16 }
  0xc6   :  { %v115_v62 = vadd.f32 %v114_v61, %v112_v60 }
  0xc8   :  { %v116_v63 = vmul.f32 0.9, %v115_v62  ;;  %vm117_vm15 = vcmp.gt.f32.partialorder %v115_v62, 1.0 }
  0xc9   :  { %v118_v0 = vsel %vm117_vm15, %v531_v17, %v528_v16 }
  0xca   :  { %v119_v1 = vadd.f32 %v118_v0, %v116_v63 }
  0xcc   :  { %v120_v2 = vmul.f32 0.9, %v119_v1  ;;  %vm121_vm0 = vcmp.gt.f32.partialorder %v119_v1, 1.0 }
  0xcd   :  { %v122_v3 = vsel %vm121_vm0, %v531_v17, %v528_v16 }
  0xce   :  { %v123_v4 = vadd.f32 %v122_v3, %v120_v2 }
  0xd0   :  { %v124_v5 = vmul.f32 0.9, %v123_v4  ;;  %vm125_vm1 = vcmp.gt.f32.partialorder %v123_v4, 1.0 }
  0xd1   :  { %v126_v6 = vsel %vm125_vm1, %v531_v17, %v528_v16 }
  0xd2   :  { %v127_v7 = vadd.f32 %v126_v6, %v124_v5 }
  0xd4   :  { %v128_v8 = vmul.f32 0.9, %v127_v7  ;;  %vm129_vm2 = vcmp.gt.f32.partialorder %v127_v7, 1.0 }
  0xd5   :  { %v130_v9 = vsel %vm129_vm2, %v531_v17, %v528_v16 }
  0xd6   :  { %v131_v10 = vadd.f32 %v130_v9, %v128_v8 }
  0xd8   :  { %v132_v11 = vmul.f32 0.9, %v131_v10  ;;  %vm133_vm3 = vcmp.gt.f32.partialorder %v131_v10, 1.0 }
  0xd9   :  { %v134_v12 = vsel %vm133_vm3, %v531_v17, %v528_v16 }
  0xda   :  { %v135_v13 = vadd.f32 %v134_v12, %v132_v11 }
  0xdc   :  { %v136_v14 = vmul.f32 0.9, %v135_v13  ;;  %vm137_vm4 = vcmp.gt.f32.partialorder %v135_v13, 1.0 }
  0xdd   :  { %v138_v15 = vsel %vm137_vm4, %v531_v17, %v528_v16 }
  0xde   :  { %v139_v18 = vadd.f32 %v138_v15, %v136_v14 }
  0xe0   :  { %v140_v19 = vmul.f32 0.9, %v139_v18  ;;  %vm141_vm5 = vcmp.gt.f32.partialorder %v139_v18, 1.0 }
  0xe1   :  { %v142_v20 = vsel %vm141_vm5, %v531_v17, %v528_v16 }
  0xe2   :  { %v143_v21 = vadd.f32 %v142_v20, %v140_v19 }
  0xe4   :  { %v144_v22 = vmul.f32 0.9, %v143_v21  ;;  %vm145_vm6 = vcmp.gt.f32.partialorder %v143_v21, 1.0 }
  0xe5   :  { %v146_v23 = vsel %vm145_vm6, %v531_v17, %v528_v16 }
  0xe6   :  { %v147_v24 = vadd.f32 %v146_v23, %v144_v22 }
  0xe8   :  { %v148_v25 = vmul.f32 0.9, %v147_v24  ;;  %vm149_vm7 = vcmp.gt.f32.partialorder %v147_v24, 1.0 }
  0xe9   :  { %v150_v26 = vsel %vm149_vm7, %v531_v17, %v528_v16 }
  0xea   :  { %v151_v27 = vadd.f32 %v150_v26, %v148_v25 }
  0xec   :  { %v152_v28 = vmul.f32 0.9, %v151_v27  ;;  %vm153_vm8 = vcmp.gt.f32.partialorder %v151_v27, 1.0 }
  0xed   :  { %v154_v29 = vsel %vm153_vm8, %v531_v17, %v528_v16 }
  0xee   :  { %v155_v30 = vadd.f32 %v154_v29, %v152_v28 }
  0xf0   :  { %v156_v31 = vmul.f32 0.9, %v155_v30  ;;  %vm157_vm9 = vcmp.gt.f32.partialorder %v155_v30, 1.0 }
  0xf1   :  { %v158_v32 = vsel %vm157_vm9, %v531_v17, %v528_v16 }
  0xf2   :  { %v159_v33 = vadd.f32 %v158_v32, %v156_v31 }
  0xf4   :  { %v160_v34 = vmul.f32 0.9, %v159_v33  ;;  %vm161_vm10 = vcmp.gt.f32.partialorder %v159_v33, 1.0 }
  0xf5   :  { %v162_v35 = vsel %vm161_vm10, %v531_v17, %v528_v16 }
  0xf6   :  { %v163_v36 = vadd.f32 %v162_v35, %v160_v34 }
  0xf8   :  { %v164_v37 = vmul.f32 0.9, %v163_v36  ;;  %vm165_vm11 = vcmp.gt.f32.partialorder %v163_v36, 1.0 }
  0xf9   :  { %v166_v38 = vsel %vm165_vm11, %v531_v17, %v528_v16 }
  0xfa   :  { %v167_v39 = vadd.f32 %v166_v38, %v164_v37 }
  0xfc   :  { %v168_v40 = vmul.f32 0.9, %v167_v39  ;;  %vm169_vm12 = vcmp.gt.f32.partialorder %v167_v39, 1.0 }
  0xfd   :  { %v170_v41 = vsel %vm169_vm12, %v531_v17, %v528_v16 }
  0xfe   :  { %v171_v42 = vadd.f32 %v170_v41, %v168_v40 }
 0x100   :  { %v172_v43 = vmul.f32 0.9, %v171_v42  ;;  %vm173_vm13 = vcmp.gt.f32.partialorder %v171_v42, 1.0 }
 0x101   :  { %v174_v44 = vsel %vm173_vm13, %v531_v17, %v528_v16 }
 0x102   :  { %v175_v45 = vadd.f32 %v174_v44, %v172_v43 }
 0x104   :  { %v176_v46 = vmul.f32 0.9, %v175_v45  ;;  %vm177_vm14 = vcmp.gt.f32.partialorder %v175_v45, 1.0 }
 0x105   :  { %v178_v47 = vsel %vm177_vm14, %v531_v17, %v528_v16 }
 0x106   :  { %v179_v48 = vadd.f32 %v178_v47, %v176_v46 }
 0x108   :  { %v180_v49 = vmul.f32 0.9, %v179_v48  ;;  %vm181_vm15 = vcmp.gt.f32.partialorder %v179_v48, 1.0 }
 0x109   :  { %v182_v50 = vsel %vm181_vm15, %v531_v17, %v528_v16 }
 0x10a   :  { %v183_v51 = vadd.f32 %v182_v50, %v180_v49 }
 0x10c   :  { %v184_v52 = vmul.f32 0.9, %v183_v51  ;;  %vm185_vm0 = vcmp.gt.f32.partialorder %v183_v51, 1.0 }
 0x10d   :  { %v186_v53 = vsel %vm185_vm0, %v531_v17, %v528_v16 }
 0x10e   :  { %v187_v54 = vadd.f32 %v186_v53, %v184_v52 }
 0x110   :  { %v188_v55 = vmul.f32 0.9, %v187_v54  ;;  %vm189_vm1 = vcmp.gt.f32.partialorder %v187_v54, 1.0 }
 0x111   :  { %v190_v56 = vsel %vm189_vm1, %v531_v17, %v528_v16 }
 0x112   :  { %v191_v57 = vadd.f32 %v190_v56, %v188_v55 }
 0x114   :  { %v192_v58 = vmul.f32 0.9, %v191_v57  ;;  %vm193_vm2 = vcmp.gt.f32.partialorder %v191_v57, 1.0 }
 0x115   :  { %v194_v59 = vsel %vm193_vm2, %v531_v17, %v528_v16 }
 0x116   :  { %v195_v60 = vadd.f32 %v194_v59, %v192_v58 }
 0x118   :  { %v196_v61 = vmul.f32 0.9, %v195_v60  ;;  %vm197_vm3 = vcmp.gt.f32.partialorder %v195_v60, 1.0 }
 0x119   :  { %v198_v62 = vsel %vm197_vm3, %v531_v17, %v528_v16 }
 0x11a   :  { %v199_v63 = vadd.f32 %v198_v62, %v196_v61 }
 0x11c   :  { %v200_v0 = vmul.f32 0.9, %v199_v63  ;;  %vm201_vm4 = vcmp.gt.f32.partialorder %v199_v63, 1.0 }
 0x11d   :  { %v202_v1 = vsel %vm201_vm4, %v531_v17, %v528_v16 }
 0x11e   :  { %v203_v2 = vadd.f32 %v202_v1, %v200_v0 }
 0x120   :  { %v204_v3 = vmul.f32 0.9, %v203_v2  ;;  %vm205_vm5 = vcmp.gt.f32.partialorder %v203_v2, 1.0 }
 0x121   :  { %v206_v4 = vsel %vm205_vm5, %v531_v17, %v528_v16 }
 0x122   :  { %v207_v5 = vadd.f32 %v206_v4, %v204_v3 }
 0x124   :  { %v208_v6 = vmul.f32 0.9, %v207_v5  ;;  %vm209_vm6 = vcmp.gt.f32.partialorder %v207_v5, 1.0 }
 0x125   :  { %v210_v7 = vsel %vm209_vm6, %v531_v17, %v528_v16 }
 0x126   :  { %v211_v8 = vadd.f32 %v210_v7, %v208_v6 }
 0x128   :  { %v212_v9 = vmul.f32 0.9, %v211_v8  ;;  %vm213_vm7 = vcmp.gt.f32.partialorder %v211_v8, 1.0 }
 0x129   :  { %v214_v10 = vsel %vm213_vm7, %v531_v17, %v528_v16 }
 0x12a   :  { %v215_v11 = vadd.f32 %v214_v10, %v212_v9 }
 0x12c   :  { %v216_v12 = vmul.f32 0.9, %v215_v11  ;;  %vm217_vm8 = vcmp.gt.f32.partialorder %v215_v11, 1.0 }
 0x12d   :  { %v218_v13 = vsel %vm217_vm8, %v531_v17, %v528_v16 }
 0x12e   :  { %v219_v14 = vadd.f32 %v218_v13, %v216_v12 }
 0x130   :  { %v220_v15 = vmul.f32 0.9, %v219_v14  ;;  %vm221_vm9 = vcmp.gt.f32.partialorder %v219_v14, 1.0 }
 0x131   :  { %v222_v18 = vsel %vm221_vm9, %v531_v17, %v528_v16 }
 0x132   :  { %v223_v19 = vadd.f32 %v222_v18, %v220_v15 }
 0x134   :  { %v224_v20 = vmul.f32 0.9, %v223_v19  ;;  %vm225_vm10 = vcmp.gt.f32.partialorder %v223_v19, 1.0 }
 0x135   :  { %v226_v21 = vsel %vm225_vm10, %v531_v17, %v528_v16 }
 0x136   :  { %v227_v22 = vadd.f32 %v226_v21, %v224_v20 }
 0x138   :  { %v228_v23 = vmul.f32 0.9, %v227_v22  ;;  %vm229_vm11 = vcmp.gt.f32.partialorder %v227_v22, 1.0 }
 0x139   :  { %v230_v24 = vsel %vm229_vm11, %v531_v17, %v528_v16 }
 0x13a   :  { %v231_v25 = vadd.f32 %v230_v24, %v228_v23 }
 0x13c   :  { %v232_v26 = vmul.f32 0.9, %v231_v25  ;;  %vm233_vm12 = vcmp.gt.f32.partialorder %v231_v25, 1.0 }
 0x13d   :  { %v234_v27 = vsel %vm233_vm12, %v531_v17, %v528_v16 }
 0x13e   :  { %v235_v28 = vadd.f32 %v234_v27, %v232_v26 }
 0x140   :  { %v236_v29 = vmul.f32 0.9, %v235_v28  ;;  %vm237_vm13 = vcmp.gt.f32.partialorder %v235_v28, 1.0 }
 0x141   :  { %v238_v30 = vsel %vm237_vm13, %v531_v17, %v528_v16 }
 0x142   :  { %v239_v31 = vadd.f32 %v238_v30, %v236_v29 }
 0x144   :  { %v240_v32 = vmul.f32 0.9, %v239_v31  ;;  %vm241_vm14 = vcmp.gt.f32.partialorder %v239_v31, 1.0 }
 0x145   :  { %v242_v33 = vsel %vm241_vm14, %v531_v17, %v528_v16 }
 0x146   :  { %v243_v34 = vadd.f32 %v242_v33, %v240_v32 }
 0x148   :  { %v244_v35 = vmul.f32 0.9, %v243_v34  ;;  %vm245_vm15 = vcmp.gt.f32.partialorder %v243_v34, 1.0 }
 0x149   :  { %v246_v36 = vsel %vm245_vm15, %v531_v17, %v528_v16 }
 0x14a   :  { %v247_v37 = vadd.f32 %v246_v36, %v244_v35 }
 0x14c   :  { %v248_v38 = vmul.f32 0.9, %v247_v37  ;;  %vm249_vm0 = vcmp.gt.f32.partialorder %v247_v37, 1.0  ;;  %v10_v37 = vstv %s745_s4 }
 0x14d   :  { %v250_v39 = vsel %vm249_vm0, %v531_v17, %v528_v16  ;;  %11 = vst [vmem:[#allocation2] sm:$0x1] %v10_v37 }
 0x14e   :  { %v251_v40 = vadd.f32 %v250_v39, %v248_v38 }
 0x150   :  { %v252_v41 = vmul.f32 0.9, %v251_v40  ;;  %vm253_vm1 = vcmp.gt.f32.partialorder %v251_v40, 1.0 }
 0x151   :  { %v254_v42 = vsel %vm253_vm1, %v531_v17, %v528_v16 }
 0x152   :  { %v255_v43 = vadd.f32 %v254_v42, %v252_v41 }
 0x154   :  { %v256_v44 = vmul.f32 0.9, %v255_v43  ;;  %vm257_vm2 = vcmp.gt.f32.partialorder %v255_v43, 1.0 }
 0x155   :  { %v258_v45 = vsel %vm257_vm2, %v531_v17, %v528_v16 }
 0x156   :  { %v259_v46 = vadd.f32 %v258_v45, %v256_v44 }
 0x158   :  { %v260_v47 = vmul.f32 0.9, %v259_v46  ;;  %vm261_vm3 = vcmp.gt.f32.partialorder %v259_v46, 1.0 }
 0x159   :  { %v262_v48 = vsel %vm261_vm3, %v531_v17, %v528_v16 }
 0x15a   :  { %v263_v49 = vadd.f32 %v262_v48, %v260_v47 }
 0x15c   :  { %v264_v50 = vmul.f32 0.9, %v263_v49  ;;  %vm265_vm4 = vcmp.gt.f32.partialorder %v263_v49, 1.0 }
 0x15d   :  { %v266_v51 = vsel %vm265_vm4, %v531_v17, %v528_v16 }
 0x15e   :  { %v267_v52 = vadd.f32 %v266_v51, %v264_v50 }
 0x160   :  { %v268_v53 = vmul.f32 0.9, %v267_v52  ;;  %vm269_vm5 = vcmp.gt.f32.partialorder %v267_v52, 1.0 }
 0x161   :  { %v270_v54 = vsel %vm269_vm5, %v531_v17, %v528_v16 }
 0x162   :  { %v271_v55 = vadd.f32 %v270_v54, %v268_v53 }
 0x164   :  { %v272_v56 = vmul.f32 0.9, %v271_v55  ;;  %vm273_vm6 = vcmp.gt.f32.partialorder %v271_v55, 1.0 }
 0x165   :  { %v274_v57 = vsel %vm273_vm6, %v531_v17, %v528_v16 }
 0x166   :  { %v275_v58 = vadd.f32 %v274_v57, %v272_v56 }
 0x168   :  { %v276_v59 = vmul.f32 0.9, %v275_v58  ;;  %vm277_vm7 = vcmp.gt.f32.partialorder %v275_v58, 1.0 }
 0x169   :  { %v278_v60 = vsel %vm277_vm7, %v531_v17, %v528_v16 }
 0x16a   :  { %v279_v61 = vadd.f32 %v278_v60, %v276_v59 }
 0x16c   :  { %v280_v62 = vmul.f32 0.9, %v279_v61  ;;  %vm281_vm8 = vcmp.gt.f32.partialorder %v279_v61, 1.0 }
 0x16d   :  { %v282_v63 = vsel %vm281_vm8, %v531_v17, %v528_v16 }
 0x16e   :  { %v283_v0 = vadd.f32 %v282_v63, %v280_v62 }
 0x170   :  { %v284_v1 = vmul.f32 0.9, %v283_v0  ;;  %vm285_vm9 = vcmp.gt.f32.partialorder %v283_v0, 1.0 }
 0x171   :  { %v286_v2 = vsel %vm285_vm9, %v531_v17, %v528_v16 }
 0x172   :  { %v287_v3 = vadd.f32 %v286_v2, %v284_v1 }
 0x174   :  { %v288_v4 = vmul.f32 0.9, %v287_v3  ;;  %vm289_vm10 = vcmp.gt.f32.partialorder %v287_v3, 1.0 }
 0x175   :  { %v290_v5 = vsel %vm289_vm10, %v531_v17, %v528_v16 }
 0x176   :  { %v291_v6 = vadd.f32 %v290_v5, %v288_v4 }
 0x178   :  { %v292_v7 = vmul.f32 0.9, %v291_v6  ;;  %vm293_vm11 = vcmp.gt.f32.partialorder %v291_v6, 1.0 }
 0x179   :  { %v294_v8 = vsel %vm293_vm11, %v531_v17, %v528_v16 }
 0x17a   :  { %v295_v9 = vadd.f32 %v294_v8, %v292_v7 }
 0x17c   :  { %v296_v10 = vmul.f32 0.9, %v295_v9  ;;  %vm297_vm12 = vcmp.gt.f32.partialorder %v295_v9, 1.0 }
 0x17d   :  { %v298_v11 = vsel %vm297_vm12, %v531_v17, %v528_v16 }
 0x17e   :  { %v299_v12 = vadd.f32 %v298_v11, %v296_v10 }
 0x180   :  { %v300_v13 = vmul.f32 0.9, %v299_v12  ;;  %vm301_vm13 = vcmp.gt.f32.partialorder %v299_v12, 1.0 }
 0x181   :  { %v302_v14 = vsel %vm301_vm13, %v531_v17, %v528_v16 }
 0x182   :  { %v303_v15 = vadd.f32 %v302_v14, %v300_v13 }
 0x184   :  { %v304_v18 = vmul.f32 0.9, %v303_v15  ;;  %vm305_vm14 = vcmp.gt.f32.partialorder %v303_v15, 1.0 }
 0x185   :  { %v306_v19 = vsel %vm305_vm14, %v531_v17, %v528_v16 }
 0x186   :  { %v307_v20 = vadd.f32 %v306_v19, %v304_v18 }
 0x188   :  { %v308_v21 = vmul.f32 0.9, %v307_v20  ;;  %vm309_vm15 = vcmp.gt.f32.partialorder %v307_v20, 1.0 }
 0x189   :  { %v310_v22 = vsel %vm309_vm15, %v531_v17, %v528_v16 }
 0x18a   :  { %v311_v23 = vadd.f32 %v310_v22, %v308_v21 }
 0x18c   :  { %v312_v24 = vmul.f32 0.9, %v311_v23  ;;  %vm313_vm0 = vcmp.gt.f32.partialorder %v311_v23, 1.0 }
 0x18d   :  { %v314_v25 = vsel %vm313_vm0, %v531_v17, %v528_v16 }
 0x18e   :  { %v315_v26 = vadd.f32 %v314_v25, %v312_v24 }
 0x190   :  { %v316_v27 = vmul.f32 0.9, %v315_v26  ;;  %vm317_vm1 = vcmp.gt.f32.partialorder %v315_v26, 1.0 }
 0x191   :  { %v318_v28 = vsel %vm317_vm1, %v531_v17, %v528_v16 }
 0x192   :  { %v319_v29 = vadd.f32 %v318_v28, %v316_v27 }
 0x194   :  { %v320_v30 = vmul.f32 0.9, %v319_v29  ;;  %vm321_vm2 = vcmp.gt.f32.partialorder %v319_v29, 1.0 }
 0x195   :  { %v322_v31 = vsel %vm321_vm2, %v531_v17, %v528_v16 }
 0x196   :  { %v323_v32 = vadd.f32 %v322_v31, %v320_v30 }
 0x198   :  { %v324_v33 = vmul.f32 0.9, %v323_v32  ;;  %vm325_vm3 = vcmp.gt.f32.partialorder %v323_v32, 1.0 }
 0x199   :  { %v326_v34 = vsel %vm325_vm3, %v531_v17, %v528_v16 }
 0x19a   :  { %v327_v35 = vadd.f32 %v326_v34, %v324_v33 }
 0x19c   :  { %v328_v36 = vmul.f32 0.9, %v327_v35  ;;  %vm329_vm4 = vcmp.gt.f32.partialorder %v327_v35, 1.0 }
 0x19d   :  { %v330_v38 = vsel %vm329_vm4, %v531_v17, %v528_v16 }
 0x19e   :  { %v331_v39 = vadd.f32 %v330_v38, %v328_v36 }
 0x1a0   :  { %v332_v40 = vmul.f32 0.9, %v331_v39  ;;  %vm333_vm5 = vcmp.gt.f32.partialorder %v331_v39, 1.0 }
 0x1a1   :  { %v334_v41 = vsel %vm333_vm5, %v531_v17, %v528_v16 }
 0x1a2   :  { %v335_v42 = vadd.f32 %v334_v41, %v332_v40 }
 0x1a4   :  { %v336_v43 = vmul.f32 0.9, %v335_v42  ;;  %vm337_vm6 = vcmp.gt.f32.partialorder %v335_v42, 1.0 }
 0x1a5   :  { %v338_v44 = vsel %vm337_vm6, %v531_v17, %v528_v16 }
 0x1a6   :  { %v339_v45 = vadd.f32 %v338_v44, %v336_v43 }
 0x1a8   :  { %v340_v46 = vmul.f32 0.9, %v339_v45  ;;  %vm341_vm7 = vcmp.gt.f32.partialorder %v339_v45, 1.0 }
 0x1a9   :  { %v342_v47 = vsel %vm341_vm7, %v531_v17, %v528_v16 }
 0x1aa   :  { %v343_v48 = vadd.f32 %v342_v47, %v340_v46 }
 0x1ac   :  { %v344_v49 = vmul.f32 0.9, %v343_v48  ;;  %vm345_vm8 = vcmp.gt.f32.partialorder %v343_v48, 1.0 }
 0x1ad   :  { %v346_v50 = vsel %vm345_vm8, %v531_v17, %v528_v16 }
 0x1ae   :  { %v347_v51 = vadd.f32 %v346_v50, %v344_v49 }
 0x1b0   :  { %v348_v52 = vmul.f32 0.9, %v347_v51  ;;  %vm349_vm9 = vcmp.gt.f32.partialorder %v347_v51, 1.0 }
 0x1b1   :  { %v350_v53 = vsel %vm349_vm9, %v531_v17, %v528_v16 }
 0x1b2   :  { %v351_v54 = vadd.f32 %v350_v53, %v348_v52 }
 0x1b4   :  { %v352_v55 = vmul.f32 0.9, %v351_v54  ;;  %vm353_vm10 = vcmp.gt.f32.partialorder %v351_v54, 1.0 }
 0x1b5   :  { %v354_v56 = vsel %vm353_vm10, %v531_v17, %v528_v16 }
 0x1b6   :  { %v355_v57 = vadd.f32 %v354_v56, %v352_v55 }
 0x1b8   :  { %v356_v58 = vmul.f32 0.9, %v355_v57  ;;  %vm357_vm11 = vcmp.gt.f32.partialorder %v355_v57, 1.0 }
 0x1b9   :  { %v358_v59 = vsel %vm357_vm11, %v531_v17, %v528_v16 }
 0x1ba   :  { %v359_v60 = vadd.f32 %v358_v59, %v356_v58 }
 0x1bc   :  { %v360_v61 = vmul.f32 0.9, %v359_v60  ;;  %vm361_vm12 = vcmp.gt.f32.partialorder %v359_v60, 1.0 }
 0x1bd   :  { %v362_v62 = vsel %vm361_vm12, %v531_v17, %v528_v16 }
 0x1be   :  { %v363_v63 = vadd.f32 %v362_v62, %v360_v61 }
 0x1c0   :  { %v364_v0 = vmul.f32 0.9, %v363_v63  ;;  %vm365_vm13 = vcmp.gt.f32.partialorder %v363_v63, 1.0 }
 0x1c1   :  { %v366_v1 = vsel %vm365_vm13, %v531_v17, %v528_v16 }
 0x1c2   :  { %v367_v2 = vadd.f32 %v366_v1, %v364_v0 }
 0x1c4   :  { %v368_v3 = vmul.f32 0.9, %v367_v2  ;;  %vm369_vm14 = vcmp.gt.f32.partialorder %v367_v2, 1.0 }
 0x1c5   :  { %v370_v4 = vsel %vm369_vm14, %v531_v17, %v528_v16 }
 0x1c6   :  { %v371_v5 = vadd.f32 %v370_v4, %v368_v3  ;;  %v481_v4 = vld [vmem:[%s746_s3] ss:$0 sm:$0xff] }
 0x1c8   :  { %v372_v6 = vmul.f32 0.9, %v371_v5  ;;  %vm373_vm15 = vcmp.gt.f32.partialorder %v371_v5, 1.0 }
 0x1c9   :  { %v374_v7 = vsel %vm373_vm15, %v531_v17, %v528_v16 }
 0x1ca   :  { %v375_v8 = vadd.f32 %v374_v7, %v372_v6  ;;  %v482_v7 = vld [vmem:[#allocation2] ss:$0 sm:$0xff] }
 0x1cc   :  { %v376_v9 = vmul.f32 0.9, %v375_v8  ;;  %vm377_vm0 = vcmp.gt.f32.partialorder %v375_v8, 1.0 }
 0x1cd   :  { %v378_v10 = vsel %vm377_vm0, %v531_v17, %v528_v16 }
 0x1ce   :  { %v379_v11 = vadd.f32 %v378_v10, %v376_v9 }
 0x1d0   :  { %v380_v12 = vmul.f32 0.9, %v379_v11  ;;  %vm381_vm1 = vcmp.gt.f32.partialorder %v379_v11, 1.0 }
 0x1d1   :  { %v382_v13 = vsel %vm381_vm1, %v531_v17, %v528_v16 }
 0x1d2   :  { %v383_v14 = vadd.f32 %v382_v13, %v380_v12 }
 0x1d4   :  { %v384_v15 = vmul.f32 0.9, %v383_v14  ;;  %vm385_vm2 = vcmp.gt.f32.partialorder %v383_v14, 1.0 }
 0x1d5   :  { %v386_v18 = vsel %vm385_vm2, %v531_v17, %v528_v16 }
 0x1d6   :  { %v387_v19 = vadd.f32 %v386_v18, %v384_v15 }
 0x1d8   :  { %v388_v20 = vmul.f32 0.9, %v387_v19  ;;  %vm389_vm3 = vcmp.gt.f32.partialorder %v387_v19, 1.0 }
 0x1d9   :  { %v390_v21 = vsel %vm389_vm3, %v531_v17, %v528_v16  ;;  %vm461_vm3 = vcmask 523264  }
 0x1da   :  { %v391_v22 = vadd.f32 %v390_v21, %v388_v20 }
 0x1dc   :  { %v392_v23 = vmul.f32 0.9, %v391_v22  ;;  %vm393_vm4 = vcmp.gt.f32.partialorder %v391_v22, 1.0 }
 0x1dd   :  { %v394_v24 = vsel %vm393_vm4, %v531_v17, %v528_v16 }
 0x1de   :  { %v395_v25 = vadd.f32 %v394_v24, %v392_v23 }
 0x1e0   :  { %v396_v26 = vmul.f32 0.9, %v395_v25  ;;  %vm397_vm5 = vcmp.gt.f32.partialorder %v395_v25, 1.0 }
 0x1e1   :  { %v398_v27 = vsel %vm397_vm5, %v531_v17, %v528_v16  ;;  %vm473_vm5 = vcmask 7168  }
 0x1e2   :  { %v399_v28 = vadd.f32 %v398_v27, %v396_v26 }
 0x1e4   :  { %v400_v29 = vmul.f32 0.9, %v399_v28  ;;  %vm401_vm6 = vcmp.gt.f32.partialorder %v399_v28, 1.0 }
 0x1e5   :  { %v402_v30 = vsel %vm401_vm6, %v531_v17, %v528_v16 }
 0x1e6   :  { %v403_v31 = vadd.f32 %v402_v30, %v400_v29 }
 0x1e8   :  { %v404_v32 = vmul.f32 0.9, %v403_v31  ;;  %vm405_vm7 = vcmp.gt.f32.partialorder %v403_v31, 1.0 }
 0x1e9   :  { %v406_v33 = vsel %vm405_vm7, %v531_v17, %v528_v16 }
 0x1ea   :  { %v407_v34 = vadd.f32 %v406_v33, %v404_v32 }
 0x1ec   :  { %v408_v35 = vmul.f32 0.9, %v407_v34  ;;  %vm409_vm8 = vcmp.gt.f32.partialorder %v407_v34, 1.0 }
 0x1ed   :  { %v410_v36 = vsel %vm409_vm8, %v531_v17, %v528_v16 }
 0x1ee   :  { %v411_v37 = vadd.f32 %v410_v36, %v408_v35 }
 0x1f0   :  { %v412_v38 = vmul.f32 0.9, %v411_v37  ;;  %vm413_vm9 = vcmp.gt.f32.partialorder %v411_v37, 1.0 }
 0x1f1   :  { %v414_v39 = vsel %vm413_vm9, %v531_v17, %v528_v16 }
 0x1f2   :  { %v415_v40 = vadd.f32 %v414_v39, %v412_v38 }
 0x1f4   :  { %v416_v41 = vmul.f32 0.9, %v415_v40  ;;  %vm417_vm10 = vcmp.gt.f32.partialorder %v415_v40, 1.0 }
 0x1f5   :  { %v418_v42 = vsel %vm417_vm10, %v531_v17, %v528_v16 }
 0x1f6   :  { %v419_v43 = vadd.f32 %v418_v42, %v416_v41 }
 0x1f8   :  { %v420_v44 = vmul.f32 0.9, %v419_v43  ;;  %vm421_vm11 = vcmp.gt.f32.partialorder %v419_v43, 1.0 }
 0x1f9   :  { %v422_v45 = vsel %vm421_vm11, %v531_v17, %v528_v16 }
 0x1fa   :  { %v423_v46 = vadd.f32 %v422_v45, %v420_v44 }
 0x1fc   :  { %v424_v47 = vmul.f32 0.9, %v423_v46  ;;  %vm425_vm12 = vcmp.gt.f32.partialorder %v423_v46, 1.0 }
 0x1fd   :  { %v426_v48 = vsel %vm425_vm12, %v531_v17, %v528_v16 }
 0x1fe   :  { %v427_v49 = vadd.f32 %v426_v48, %v424_v47 }
 0x200   :  { %v428_v50 = vmul.f32 0.9, %v427_v49  ;;  %vm429_vm13 = vcmp.gt.f32.partialorder %v427_v49, 1.0 }
 0x201   :  { %v430_v51 = vsel %vm429_vm13, %v531_v17, %v528_v16 }
 0x202   :  { %v431_v52 = vadd.f32 %v430_v51, %v428_v50 }
 0x204   :  { %v432_v53 = vmul.f32 0.9, %v431_v52  ;;  %vm433_vm14 = vcmp.gt.f32.partialorder %v431_v52, 1.0 }
 0x205   :  { %v434_v54 = vsel %vm433_vm14, %v531_v17, %v528_v16 }
 0x206   :  { %v435_v55 = vadd.f32 %v434_v54, %v432_v53 }
 0x208   :  { %v436_v56 = vmul.f32 0.9, %v435_v55  ;;  %vm437_vm15 = vcmp.gt.f32.partialorder %v435_v55, 1.0 }
 0x209   :  { %v438_v57 = vsel %vm437_vm15, %v531_v17, %v528_v16 }
 0x20a   :  { %v439_v58 = vadd.f32 %v438_v57, %v436_v56 }
 0x20c   :  { %v440_v59 = vmul.f32 0.9, %v439_v58  ;;  %vm441_vm0 = vcmp.gt.f32.partialorder %v439_v58, 1.0 }
 0x20d   :  { %v442_v60 = vsel %vm441_vm0, %v531_v17, %v528_v16 }
 0x20e   :  { %v443_v61 = vadd.f32 %v442_v60, %v440_v59 }
 0x210   :  { %v444_v62 = vmul.f32 0.9, %v443_v61  ;;  %vm445_vm1 = vcmp.gt.f32.partialorder %v443_v61, 1.0 }
 0x211   :  { %v446_v63 = vsel %vm445_vm1, %v531_v17, %v528_v16 }
 0x212   :  { %v447_v0 = vadd.f32 %v446_v63, %v444_v62 }
 0x214   :  { %v448_v1 = vmul.f32 0.9, %v447_v0  ;;  %vm449_vm2 = vcmp.gt.f32.partialorder %v447_v0, 1.0 }
 0x215   :  { %v450_v2 = vsel %vm449_vm2, %v531_v17, %v528_v16 }
 0x216   :  { %v451_v3 = vadd.f32 %v450_v2, %v448_v1 }
 0x218   :  { %vm453_vm4 = vcmp.gt.f32.partialorder %v451_v3, 1.0 }
 0x219   :  { %v460_v5 = vsel %vm453_vm4, %v481_v4, 0.0 }
 0x21a   :  { %v462_v6 = vsel %vm461_vm3, %v460_v5, 0.0 }
 0x21b   :  { %463 = vadd.xlane.f32.xlu1 %v462_v6 }
 0x2a8   :  { %v464_v8 = vpop.xlane.xlu1 %463 }
 0x2a9   :  { %v472_v9 = vadd.f32 %v482_v7, %v464_v8 }
 0x2ab   :  { %474 = vst.msk [vmem:[%s747_s5] sm:$0xff] %vm473_vm5, %v472_v9 }

</bundles_post_ra>
